<compile_context>
chip_gen: v6e
topology: v6e:2x2x1
jax: 0.10.0
libtpu: 0.0.40
codegen_flags: <defaults>
</compile_context>

<pallas_src>
import functools

import jax
import jax.numpy as jnp
from jax import lax
from jax.experimental import pallas as pl
from jax.experimental.pallas import tpu as pltpu

BN_EPS = 1e-5
LANE = 128


def _round_up(a, b):
    return ((a + b - 1) // b) * b


def _stats_kernel(xcol_ref, w_ref, sum_ref, sumsq_ref):
    """Pass 1: conv matmul per M-tile, accumulate per-channel sum / sum of squares."""
    @pl.when(pl.program_id(0) == 0)
    def _():
        sum_ref[...] = jnp.zeros_like(sum_ref)
        sumsq_ref[...] = jnp.zeros_like(sumsq_ref)

    y = jnp.dot(xcol_ref[...], w_ref[...], preferred_element_type=jnp.float32)
    sum_ref[...] += jnp.sum(y, axis=0, keepdims=True)
    sumsq_ref[...] += jnp.sum(y * y, axis=0, keepdims=True)


def _apply_kernel(xcol_ref, w_ref, params_ref, o_ref):
    """Pass 2: recompute the tile matmul, apply folded BN scale/shift and PReLU (f32)."""
    y = jnp.dot(xcol_ref[...], w_ref[...], preferred_element_type=jnp.float32)
    scale = params_ref[0:1, :]
    shift = params_ref[1:2, :]
    alpha = params_ref[2:3, :]
    z = y * scale + shift
    o_ref[...] = jnp.where(z >= 0.0, z, alpha * z)


def _im2col(x, k, s, p):
    """x: [N, Cin, H, W] -> X_col [N*Hout*Wout, Cin*k*k] (rows: n,h,w; cols: cin,kh,kw)."""
    N, Cin, H, W = x.shape
    Hout = (H + 2 * p - k) // s + 1
    Wout = (W + 2 * p - k) // s + 1
    xp = jnp.pad(x, ((0, 0), (0, 0), (p, p), (p, p)))
    patches = []
    for kh in range(k):
        for kw in range(k):
            patches.append(xp[:, :, kh:kh + Hout * s:s, kw:kw + Wout * s:s])
    cols = jnp.stack(patches, axis=2)             # [N, Cin, k*k, Hout, Wout]
    cols = cols.transpose(0, 3, 4, 1, 2)          # [N, Hout, Wout, Cin, k*k]
    return cols.reshape(N * Hout * Wout, Cin * k * k), Hout, Wout


def conv2d_pxp_forward(x, conv_w, conv_b, bn_gamma, bn_beta, prelu_alpha,
                       *, k, s, p, tile_m=2048):
    """x: [N, Cin, H, W] f32; conv_w: [Cout, Cin, k, k]. Returns [N, Cout, Hout, Wout] f32.

    conv_b is accepted for interface parity but has no effect: training-mode BN
    subtracts the per-channel mean, which cancels a per-channel bias exactly.
    """
    del conv_b
    N, Cin, H, W = x.shape
    Cout = conv_w.shape[0]
    Cpad = _round_up(Cout, LANE)

    # im2col in bf16 (halves its HBM footprint); the matmul accumulates in f32.
    X_col, Hout, Wout = _im2col(x.astype(jnp.bfloat16), k, s, p)
    M, K = X_col.shape

    tm = min(tile_m, _round_up(M, 16))            # bf16 sublane-friendly tile height
    M_pad = _round_up(M, tm)
    nm = M_pad // tm
    if M_pad != M:
        X_col = jnp.pad(X_col, ((0, M_pad - M), (0, 0)))   # zero rows: no effect on stats

    W_col = conv_w.reshape(Cout, K).T.astype(jnp.bfloat16)            # [K, Cout]
    W_col = jnp.pad(W_col, ((0, 0), (0, Cpad - Cout)))                 # [K, Cpad] lane-dense

    x_spec = pl.BlockSpec((tm, K), lambda i: (i, 0))
    w_spec = pl.BlockSpec((K, Cpad), lambda i: (0, 0))
    vec_spec = pl.BlockSpec((1, Cpad), lambda i: (0, 0))

    # ---- Pass 1: per-channel sum / sum-of-squares over all M rows (accumulator). ----
    ch_sum, ch_sumsq = pl.pallas_call(
        _stats_kernel,
        out_shape=(jax.ShapeDtypeStruct((1, Cpad), jnp.float32),
                   jax.ShapeDtypeStruct((1, Cpad), jnp.float32)),
        grid=(nm,),
        in_specs=[x_spec, w_spec],
        out_specs=(vec_spec, vec_spec),
        compiler_params=pltpu.CompilerParams(
            dimension_semantics=("arbitrary",),
            vmem_limit_bytes=32 * 1024 * 1024),
    )(X_col, W_col)

    # ---- Fold BN (training-mode, biased variance) + gamma into one scale/shift pair. ----
    m_true = float(M)
    mean = ch_sum / m_true
    var = jnp.maximum(ch_sumsq / m_true - mean * mean, 0.0)
    inv_std = lax.rsqrt(var + BN_EPS)

    def _pad_vec(v):
        return jnp.pad(v.reshape(1, Cout).astype(jnp.float32), ((0, 0), (0, Cpad - Cout)))

    gamma = _pad_vec(bn_gamma)
    beta = _pad_vec(bn_beta)
    alpha = _pad_vec(prelu_alpha)
    scale = gamma * inv_std
    shift = beta - mean * scale
    params = jnp.concatenate(
        [scale, shift, alpha, jnp.zeros((5, Cpad), jnp.float32)], axis=0)   # (8, Cpad)

    # ---- Pass 2: normalize + affine + PReLU, lane-dense [M_pad, Cpad] output. ----
    out_flat = pl.pallas_call(
        _apply_kernel,
        out_shape=jax.ShapeDtypeStruct((M_pad, Cpad), jnp.float32),
        grid=(nm,),
        in_specs=[x_spec, w_spec, pl.BlockSpec((8, Cpad), lambda i: (0, 0))],
        out_specs=pl.BlockSpec((tm, Cpad), lambda i: (i, 0)),
        compiler_params=pltpu.CompilerParams(
            dimension_semantics=("parallel",),        # megacore sharding on v7x
            vmem_limit_bytes=32 * 1024 * 1024),
    )(X_col, W_col, params)

    out = out_flat[:M, :Cout].reshape(N, Hout, Wout, Cout).transpose(0, 3, 1, 2)
    return out


def _reference_forward(x, conv_w, conv_b, bn_gamma, bn_beta, prelu_alpha, *, k, s, p):
    """Pure-JAX reference of Conv2d -> BN(train) -> PReLU.

    Conv inputs are rounded to bf16 (same quantization the kernel's MXU inputs use)
    so the check isolates algorithmic correctness from the intended bf16 rounding.
    """
    xq = x.astype(jnp.bfloat16).astype(jnp.float32)
    wq = conv_w.astype(jnp.bfloat16).astype(jnp.float32)
    y = lax.conv_general_dilated(
        xq, wq, window_strides=(s, s), padding=[(p, p), (p, p)],
        dimension_numbers=("NCHW", "OIHW", "NCHW"),
    ) + conv_b.reshape(1, -1, 1, 1)
    mean = jnp.mean(y, axis=(0, 2, 3), keepdims=True)
    var = jnp.mean((y - mean) ** 2, axis=(0, 2, 3), keepdims=True)   # biased
    y_hat = (y - mean) / jnp.sqrt(var + BN_EPS)
    z = bn_gamma.reshape(1, -1, 1, 1) * y_hat + bn_beta.reshape(1, -1, 1, 1)
    a = prelu_alpha.reshape(1, -1, 1, 1)
    return jnp.where(z >= 0, z, a * z)


if __name__ == "__main__":
    # Module hyperparameters: Conv2D_pxp(in_ch=4, out_ch=8, k=3, s=1, p=1)
    N, Cin, H, W = 2, 4, 16, 16
    Cout, K, S, P = 8, 3, 1, 1

    key = jax.random.PRNGKey(0)
    kx, kw, kb = jax.random.split(key, 3)

    x = jax.random.normal(kx, (N, Cin, H, W), dtype=jnp.float32)

    # Deterministic parameter init (synthetic, PyTorch-default-like):
    fan_in = Cin * K * K
    bound = 1.0 / (fan_in ** 0.5)
    conv_w = jax.random.uniform(kw, (Cout, Cin, K, K), minval=-bound, maxval=bound, dtype=jnp.float32)
    conv_b = jax.random.uniform(kb, (Cout,), minval=-bound, maxval=bound, dtype=jnp.float32)
    bn_gamma = jnp.ones((Cout,), jnp.float32)            # BatchNorm2d default weight
    bn_beta = jnp.zeros((Cout,), jnp.float32)            # BatchNorm2d default bias
    prelu_alpha = jnp.full((Cout,), 0.25, jnp.float32)   # PReLU default init

    fwd = jax.jit(functools.partial(conv2d_pxp_forward, k=K, s=S, p=P))
    out = jax.block_until_ready(fwd(x, conv_w, conv_b, bn_gamma, bn_beta, prelu_alpha))

    ref = _reference_forward(x, conv_w, conv_b, bn_gamma, bn_beta, prelu_alpha, k=K, s=S, p=P)
    assert out.shape == (N, Cout, H, W)
    assert jnp.allclose(out, ref, atol=2e-3, rtol=2e-3), "mismatch vs pure-JAX reference"

    print("KERNEL_OK")
</pallas_src>

<mosaic_0001>
module attributes {stable_mosaic.version = 11 : i64} {
  func.func @_stats_kernel(%arg0: i32, %arg1: memref<512x36xbf16, #tpu.memory_space<vmem>>, %arg2: memref<36x128xbf16, #tpu.memory_space<vmem>>, %arg3: memref<1x128xf32, #tpu.memory_space<vmem>>, %arg4: memref<1x128xf32, #tpu.memory_space<vmem>>) attributes {dimension_semantics = [#tpu.dimension_semantics<arbitrary>], iteration_bounds = array<i64: 1>, scalar_prefetch = 0 : i64, scratch_operands = 0 : i64, tpu.core_type = #tpu.core_type<tc>, window_params = [{transform_indices = @transform_0, window_bounds = array<i64: 512, 36>}, {pipeline_mode = #tpu.pipeline_mode<synchronous>, transform_indices = @transform_1, window_bounds = array<i64: 36, 128>}, {pipeline_mode = #tpu.pipeline_mode<synchronous>, transform_indices = @transform_2, window_bounds = array<i64: 1, 128>}, {pipeline_mode = #tpu.pipeline_mode<synchronous>, transform_indices = @transform_3, window_bounds = array<i64: 1, 128>}]} {
    %c0_i32 = arith.constant 0 : i32
    %0 = arith.cmpi eq, %arg0, %c0_i32 : i32
    %1 = arith.extui %0 : i1 to i32
    %c0_i32_0 = arith.constant 0 : i32
    %2 = arith.cmpi ne, %1, %c0_i32_0 : i32
    scf.if %2 {
      %cst_14 = arith.constant 0.000000e+00 : f32
      %17 = vector.broadcast %cst_14 : f32 to vector<1x128xf32>
      %c0_15 = arith.constant 0 : index
      %c0_16 = arith.constant 0 : index
      %18 = vector.load %arg3[%c0_15, %c0_16] : memref<1x128xf32, #tpu.memory_space<vmem>>, vector<1x128xf32>
      tpu.vector_store %arg3[%c0_15, %c0_16], %17 {strides = array<i32>} : memref<1x128xf32, #tpu.memory_space<vmem>>, vector<1x128xf32>,
      %cst_17 = arith.constant 0.000000e+00 : f32
      %19 = vector.broadcast %cst_17 : f32 to vector<1x128xf32>
      %c0_18 = arith.constant 0 : index
      %c0_19 = arith.constant 0 : index
      %20 = vector.load %arg4[%c0_18, %c0_19] : memref<1x128xf32, #tpu.memory_space<vmem>>, vector<1x128xf32>
      tpu.vector_store %arg4[%c0_18, %c0_19], %19 {strides = array<i32>} : memref<1x128xf32, #tpu.memory_space<vmem>>, vector<1x128xf32>,
    } else {
    }
    %c0 = arith.constant 0 : index
    %c0_1 = arith.constant 0 : index
    %3 = vector.load %arg1[%c0, %c0_1] : memref<512x36xbf16, #tpu.memory_space<vmem>>, vector<512x36xbf16>
    %c0_2 = arith.constant 0 : index
    %c0_3 = arith.constant 0 : index
    %4 = vector.load %arg2[%c0_2, %c0_3] : memref<36x128xbf16, #tpu.memory_space<vmem>>, vector<36x128xbf16>
    %cst = arith.constant dense<0.000000e+00> : vector<512x128xf32>
    %5 = tpu.matmul %3, %4, %cst {dimension_numbers = #tpu.dot_dimension_numbers<[1], [0], [0], [1], [0, 0, 1, 1], [], []>} : vector<512x36xbf16>, vector<36x128xbf16>, vector<512x128xf32> -> vector<512x128xf32>
    %c0_4 = arith.constant 0 : index
    %c0_5 = arith.constant 0 : index
    %6 = vector.load %arg3[%c0_4, %c0_5] : memref<1x128xf32, #tpu.memory_space<vmem>>, vector<1x128xf32>
    %cst_6 = arith.constant dense<0.000000e+00> : vector<128xf32>
    %7 = vector.multi_reduction <add>, %5, %cst_6 [0] : vector<512x128xf32> to vector<128xf32>
    %8 = vector.shape_cast %7 : vector<128xf32> to vector<1x128xf32>
    %9 = arith.addf %6, %8 : vector<1x128xf32>
    %c0_7 = arith.constant 0 : index
    %c0_8 = arith.constant 0 : index
    %10 = vector.load %arg3[%c0_7, %c0_8] : memref<1x128xf32, #tpu.memory_space<vmem>>, vector<1x128xf32>
    tpu.vector_store %arg3[%c0_7, %c0_8], %9 {strides = array<i32>} : memref<1x128xf32, #tpu.memory_space<vmem>>, vector<1x128xf32>,
    %c0_9 = arith.constant 0 : index
    %c0_10 = arith.constant 0 : index
    %11 = vector.load %arg4[%c0_9, %c0_10] : memref<1x128xf32, #tpu.memory_space<vmem>>, vector<1x128xf32>
    %12 = arith.mulf %5, %5 : vector<512x128xf32>
    %cst_11 = arith.constant dense<0.000000e+00> : vector<128xf32>
    %13 = vector.multi_reduction <add>, %12, %cst_11 [0] : vector<512x128xf32> to vector<128xf32>
    %14 = vector.shape_cast %13 : vector<128xf32> to vector<1x128xf32>
    %15 = arith.addf %11, %14 : vector<1x128xf32>
    %c0_12 = arith.constant 0 : index
    %c0_13 = arith.constant 0 : index
    %16 = vector.load %arg4[%c0_12, %c0_13] : memref<1x128xf32, #tpu.memory_space<vmem>>, vector<1x128xf32>
    tpu.vector_store %arg4[%c0_12, %c0_13], %15 {strides = array<i32>} : memref<1x128xf32, #tpu.memory_space<vmem>>, vector<1x128xf32>,
    return
  }
  func.func @transform_0(%arg0: i32) -> (i32, i32) {
    %c0_i32 = arith.constant 0 : i32
    %c0_i32_0 = arith.constant 0 : i32
    return %arg0, %c0_i32 : i32, i32
  }
  func.func @transform_1(%arg0: i32) -> (i32, i32) {
    %c0_i32 = arith.constant 0 : i32
    %c0_i32_0 = arith.constant 0 : i32
    %c0_i32_1 = arith.constant 0 : i32
    return %c0_i32, %c0_i32_0 : i32, i32
  }
  func.func @transform_2(%arg0: i32) -> (i32, i32) {
    %c0_i32 = arith.constant 0 : i32
    %c0_i32_0 = arith.constant 0 : i32
    %c0_i32_1 = arith.constant 0 : i32
    return %c0_i32, %c0_i32_0 : i32, i32
  }
  func.func @transform_3(%arg0: i32) -> (i32, i32) {
    %c0_i32 = arith.constant 0 : i32
    %c0_i32_0 = arith.constant 0 : i32
    %c0_i32_1 = arith.constant 0 : i32
    return %c0_i32, %c0_i32_0 : i32, i32
  }
}

module attributes {stable_mosaic.version = 11 : i64} {
  func.func @_apply_kernel(%arg0: i32, %arg1: memref<512x36xbf16, #tpu.memory_space<vmem>>, %arg2: memref<36x128xbf16, #tpu.memory_space<vmem>>, %arg3: memref<8x128xf32, #tpu.memory_space<vmem>>, %arg4: memref<512x128xf32, #tpu.memory_space<vmem>>) attributes {dimension_semantics = [#tpu.dimension_semantics<parallel>], iteration_bounds = array<i64: 1>, scalar_prefetch = 0 : i64, scratch_operands = 0 : i64, tpu.core_type = #tpu.core_type<tc>, window_params = [{transform_indices = @transform_0, window_bounds = array<i64: 512, 36>}, {pipeline_mode = #tpu.pipeline_mode<synchronous>, transform_indices = @transform_1, window_bounds = array<i64: 36, 128>}, {pipeline_mode = #tpu.pipeline_mode<synchronous>, transform_indices = @transform_2, window_bounds = array<i64: 8, 128>}, {transform_indices = @transform_3, window_bounds = array<i64: 512, 128>}]} {
    %c0 = arith.constant 0 : index
    %c0_0 = arith.constant 0 : index
    %0 = vector.load %arg1[%c0, %c0_0] : memref<512x36xbf16, #tpu.memory_space<vmem>>, vector<512x36xbf16>
    %c0_1 = arith.constant 0 : index
    %c0_2 = arith.constant 0 : index
    %1 = vector.load %arg2[%c0_1, %c0_2] : memref<36x128xbf16, #tpu.memory_space<vmem>>, vector<36x128xbf16>
    %cst = arith.constant dense<0.000000e+00> : vector<512x128xf32>
    %2 = tpu.matmul %0, %1, %cst {dimension_numbers = #tpu.dot_dimension_numbers<[1], [0], [0], [1], [0, 0, 1, 1], [], []>} : vector<512x36xbf16>, vector<36x128xbf16>, vector<512x128xf32> -> vector<512x128xf32>
    %c0_3 = arith.constant 0 : index
    %c0_4 = arith.constant 0 : index
    %3 = vector.load %arg3[%c0_3, %c0_4] : memref<8x128xf32, #tpu.memory_space<vmem>>, vector<1x128xf32>
    %c1 = arith.constant 1 : index
    %c0_5 = arith.constant 0 : index
    %4 = vector.load %arg3[%c1, %c0_5] : memref<8x128xf32, #tpu.memory_space<vmem>>, vector<1x128xf32>
    %c2 = arith.constant 2 : index
    %c0_6 = arith.constant 0 : index
    %5 = vector.load %arg3[%c2, %c0_6] : memref<8x128xf32, #tpu.memory_space<vmem>>, vector<1x128xf32>
    %6 = vector.broadcast %3 : vector<1x128xf32> to vector<512x128xf32>
    %7 = arith.mulf %2, %6 : vector<512x128xf32>
    %8 = vector.broadcast %4 : vector<1x128xf32> to vector<512x128xf32>
    %9 = arith.addf %7, %8 : vector<512x128xf32>
    %cst_7 = arith.constant 0.000000e+00 : f32
    %10 = vector.broadcast %cst_7 : f32 to vector<512x128xf32>
    %11 = arith.cmpf oge, %9, %10 : vector<512x128xf32>
    %12 = vector.broadcast %5 : vector<1x128xf32> to vector<512x128xf32>
    %13 = arith.mulf %12, %9 : vector<512x128xf32>
    %14 = arith.select %11, %9, %13 : vector<512x128xi1>, vector<512x128xf32>
    %c0_8 = arith.constant 0 : index
    %c0_9 = arith.constant 0 : index
    %15 = vector.load %arg4[%c0_8, %c0_9] : memref<512x128xf32, #tpu.memory_space<vmem>>, vector<512x128xf32>
    tpu.vector_store %arg4[%c0_8, %c0_9], %14 {strides = array<i32>} : memref<512x128xf32, #tpu.memory_space<vmem>>, vector<512x128xf32>,
    return
  }
  func.func @transform_0(%arg0: i32) -> (i32, i32) {
    %c0_i32 = arith.constant 0 : i32
    %c0_i32_0 = arith.constant 0 : i32
    return %arg0, %c0_i32 : i32, i32
  }
  func.func @transform_1(%arg0: i32) -> (i32, i32) {
    %c0_i32 = arith.constant 0 : i32
    %c0_i32_0 = arith.constant 0 : i32
    %c0_i32_1 = arith.constant 0 : i32
    return %c0_i32, %c0_i32_0 : i32, i32
  }
  func.func @transform_2(%arg0: i32) -> (i32, i32) {
    %c0_i32 = arith.constant 0 : i32
    %c0_i32_0 = arith.constant 0 : i32
    %c0_i32_1 = arith.constant 0 : i32
    return %c0_i32, %c0_i32_0 : i32, i32
  }
  func.func @transform_3(%arg0: i32) -> (i32, i32) {
    %c0_i32 = arith.constant 0 : i32
    %c0_i32_0 = arith.constant 0 : i32
    return %arg0, %c0_i32 : i32, i32
  }
}

</mosaic_0001>

<bundles_post_ra>
// kernel: conv2d_pxp_forward.3
= control target key start
LH: loop header
LB: loop body
LE: loop exit
PB: predicated region body
PF: predicated region fallthrough
CT: control target
= control target key end

     0   :  { %vm356_vm0 = vcmask 1041408   ;;  %vm259_vm1 = vcmask 293888   ;;  %s1847_s1 = inlined_call_operand.vmem [shape: bf16[36,128], index: 1, kind: input, shape index: {}]   ;;  %s1848_s0 = inlined_call_operand.vmem [shape: bf16[512,36], index: 0, kind: input, shape index: {}]   ;;  %s1849_s2 = inlined_call_operand.vmem [shape: f32[8,128], index: 2, kind: input, shape index: {}]   ;;  %s1850_s3 = inlined_call_operand.vmem [shape: f32[512,128], index: 3, kind: output, shape index: {}]  }
   0x1   :  { %v1235_v0 = vld [vmem:[%s1847_s1 + $0x10] ss:$0 sps:$4 sm:$0x33]   ;;  %v1236_v1 = vld [vmem:[%s1847_s1 + $0x8] sm:$0xff]   ;;  %v1237_v3 = vld [vmem:[%s1847_s1] sm:$0xff]  }
   0x2   :  { %1233 = vmatprep.subr.msk.bf16.mxu0 %vm356_vm0, %v1235_v0  ;;  %1234 = vmatprep.subr.msk.bf16.mxu1 %vm356_vm0, %v1235_v0  ;;  %v358_v2 = vsel %vm356_vm0, %v1235_v0, 0  ;;  %v1238_v4 = vld [vmem:[%s1848_s0] sm:$0xff]   ;;  %v1240_v6 = vld [vmem:[%s1848_s0 + $0x8] sm:$0xff]   ;;  %v1242_v8 = vld [vmem:[%s1848_s0 + $0x10] sm:$0xff]  }
   0x3   :  { %1158 = vmatpush3.bf16.msra.mxu0 %v358_v2  ;;  %1230 = vmatpush3.bf16.msra.mxu1 %v358_v2  ;;  %v1239_v5 = vld [vmem:[%s1848_s0 + $0x80] sm:$0xff]   ;;  %v1241_v7 = vld [vmem:[%s1848_s0 + $0x88] sm:$0xff]   ;;  %v1243_v9 = vld [vmem:[%s1848_s0 + $0x90] sm:$0xff]  }
   0x4   :  { %1159 = vmatprep.subr.bf16.mxu0 %v1236_v1  ;;  %1228 = vmatprep.subr.bf16.mxu1 %v1236_v1  ;;  %v1244_v10 = vld [vmem:[%s1848_s0 + $0x18] sm:$0xff]   ;;  %v1246_v12 = vld [vmem:[%s1848_s0 + $0x20] sm:$0xff]   ;;  %v1248_v14 = vld [vmem:[%s1848_s0 + $0x28] sm:$0xff]  }
   0x5   :  { %1163 = vmatprep.mubr.msk.bf16.mxu0 %vm259_vm1, %v1238_v4  ;;  %1195 = vmatprep.mubr.msk.bf16.mxu1 %vm259_vm1, %v1239_v5  ;;  %v1245_v11 = vld [vmem:[%s1848_s0 + $0x98] sm:$0xff]   ;;  %v1247_v13 = vld [vmem:[%s1848_s0 + $0xa0] sm:$0xff]   ;;  %v1249_v15 = vld [vmem:[%s1848_s0 + $0xa8] sm:$0xff]  }
   0x6   :  { %v1250_v16 = vld [vmem:[%s1848_s0 + $0x30] sm:$0xff]   ;;  %v1252_v18 = vld [vmem:[%s1848_s0 + $0x38] sm:$0xff]   ;;  %v1254_v20 = vld [vmem:[%s1848_s0 + $0x40] sm:$0xff]  }
   0x7   :  { %1160 = vmatpush3.bf16.msra.mxu0 %v1236_v1  ;;  %1231 = vmatpush3.bf16.msra.mxu1 %v1236_v1  ;;  %v1251_v17 = vld [vmem:[%s1848_s0 + $0xb0] sm:$0xff]   ;;  %v1253_v19 = vld [vmem:[%s1848_s0 + $0xb8] sm:$0xff]   ;;  %v1255_v21 = vld [vmem:[%s1848_s0 + $0xc0] sm:$0xff]  }
   0x8   :  { %1161 = vmatprep.subr.bf16.mxu0 %v1237_v3  ;;  %1229 = vmatprep.subr.bf16.mxu1 %v1237_v3  ;;  %v1256_v22 = vld [vmem:[%s1848_s0 + $0x48] sm:$0xff]   ;;  %v1258_v24 = vld [vmem:[%s1848_s0 + $0x50] sm:$0xff]   ;;  %v1260_v26 = vld [vmem:[%s1848_s0 + $0x58] sm:$0xff]  }
   0x9   :  { %v1257_v23 = vld [vmem:[%s1848_s0 + $0xc8] sm:$0xff]   ;;  %v1259_v25 = vld [vmem:[%s1848_s0 + $0xd0] sm:$0xff]   ;;  %v1261_v27 = vld [vmem:[%s1848_s0 + $0xd8] sm:$0xff]  }
   0xa   :  { %v1262_v28 = vld [vmem:[%s1848_s0 + $0x60] sm:$0xff]   ;;  %v1264_v30 = vld [vmem:[%s1848_s0 + $0x68] sm:$0xff]   ;;  %v1266_v32 = vld [vmem:[%s1848_s0 + $0x70] sm:$0xff]  }
   0xb   :  { %1162 = vmatpush3.bf16.msra.mxu0 %v1237_v3  ;;  %1232 = vmatpush3.bf16.msra.mxu1 %v1237_v3  ;;  %v1263_v29 = vld [vmem:[%s1848_s0 + $0xe0] sm:$0xff]   ;;  %v1265_v31 = vld [vmem:[%s1848_s0 + $0xe8] sm:$0xff]   ;;  %v1267_v33 = vld [vmem:[%s1848_s0 + $0xf0] sm:$0xff]  }
   0xc   :  { %v1268_v34 = vld [vmem:[%s1848_s0 + $0x78] sm:$0xff]   ;;  %v1430_v36 = vld [vmem:[%s1849_s2] ss:$0 sm:$0xff]  ;;  %v1435_v38 = vld [vmem:[%s1849_s2 + $0x1] ss:$0 sm:$0xff] }
   0xd   :  { %v1269_v35 = vld [vmem:[%s1848_s0 + $0xf8] sm:$0xff]   ;;  %v1442_v42 = vld [vmem:[%s1849_s2 + $0x2] ss:$0 sm:$0xff] }
   0xe   :  { %1164 = vmatmul.mubr.msk.bf16.vlgmr.msra.gmra.mxu0 %vm259_vm1, %v1240_v6  ;;  %1196 = vmatmul.mubr.msk.bf16.vlgmr.msra.gmra.mxu1 %vm259_vm1, %v1241_v7 }
   0xf   :  { %1167 = vmatprep.mubr.msk.bf16.mxu0 %vm259_vm1, %v1242_v8  ;;  %1199 = vmatprep.mubr.msk.bf16.mxu1 %vm259_vm1, %v1243_v9 }
  0x16   :  { %1168 = vmatmul.mubr.msk.bf16.gmra.mxu0 %vm259_vm1, %v1244_v10  ;;  %1200 = vmatmul.mubr.msk.bf16.gmra.mxu1 %vm259_vm1, %v1245_v11 }
  0x17   :  { %1171 = vmatprep.mubr.msk.bf16.mxu0 %vm259_vm1, %v1246_v12  ;;  %1203 = vmatprep.mubr.msk.bf16.mxu1 %vm259_vm1, %v1247_v13 }
  0x1e   :  { %1172 = vmatmul.mubr.msk.bf16.gmra.mxu0 %vm259_vm1, %v1248_v14  ;;  %1204 = vmatmul.mubr.msk.bf16.gmra.mxu1 %vm259_vm1, %v1249_v15 }
  0x1f   :  { %1175 = vmatprep.mubr.msk.bf16.mxu0 %vm259_vm1, %v1250_v16  ;;  %1207 = vmatprep.mubr.msk.bf16.mxu1 %vm259_vm1, %v1251_v17 }
  0x26   :  { %1176 = vmatmul.mubr.msk.bf16.gmra.mxu0 %vm259_vm1, %v1252_v18  ;;  %1208 = vmatmul.mubr.msk.bf16.gmra.mxu1 %vm259_vm1, %v1253_v19 }
  0x27   :  { %1179 = vmatprep.mubr.msk.bf16.mxu0 %vm259_vm1, %v1254_v20  ;;  %1211 = vmatprep.mubr.msk.bf16.mxu1 %vm259_vm1, %v1255_v21 }
  0x2e   :  { %1180 = vmatmul.mubr.msk.bf16.gmra.mxu0 %vm259_vm1, %v1256_v22  ;;  %1212 = vmatmul.mubr.msk.bf16.gmra.mxu1 %vm259_vm1, %v1257_v23 }
  0x2f   :  { %1183 = vmatprep.mubr.msk.bf16.mxu0 %vm259_vm1, %v1258_v24  ;;  %1215 = vmatprep.mubr.msk.bf16.mxu1 %vm259_vm1, %v1259_v25 }
  0x36   :  { %1184 = vmatmul.mubr.msk.bf16.gmra.mxu0 %vm259_vm1, %v1260_v26  ;;  %1216 = vmatmul.mubr.msk.bf16.gmra.mxu1 %vm259_vm1, %v1261_v27 }
  0x37   :  { %1187 = vmatprep.mubr.msk.bf16.mxu0 %vm259_vm1, %v1262_v28  ;;  %1219 = vmatprep.mubr.msk.bf16.mxu1 %vm259_vm1, %v1263_v29 }
  0x3e   :  { %1188 = vmatmul.mubr.msk.bf16.gmra.mxu0 %vm259_vm1, %v1264_v30  ;;  %1220 = vmatmul.mubr.msk.bf16.gmra.mxu1 %vm259_vm1, %v1265_v31 }
  0x3f   :  { %1191 = vmatprep.mubr.msk.bf16.mxu0 %vm259_vm1, %v1266_v32  ;;  %1223 = vmatprep.mubr.msk.bf16.mxu1 %vm259_vm1, %v1267_v33 }
  0x46   :  { %1192 = vmatmul.mubr.msk.bf16.gmra.mxu0 %vm259_vm1, %v1268_v34  ;;  %1224 = vmatmul.mubr.msk.bf16.gmra.mxu1 %vm259_vm1, %v1269_v35 }
  0xce   :  { %v1165_v37 = vpop.f32.mrf.mxu0  ;;  %v1197_v39 = vpop.f32.mrf.mxu1 }
  0xcf   :  { %v658_v40 = vmul.f32 %v1165_v37, %v1430_v36  ;;  %v690_v41 = vmul.f32 %v1197_v39, %v1430_v36 }
  0xd0   :  { %v394_v43 = vpop.f32.mrf.mxu0  ;;  %v522_v44 = vpop.f32.mrf.mxu1 }
  0xd1   :  { %v726_v45 = vadd.f32 %v1435_v38, %v658_v40  ;;  %v758_v46 = vadd.f32 %v1435_v38, %v690_v41  ;;  %v656_v47 = vmul.f32 %v1430_v36, %v394_v43  ;;  %v688_v48 = vmul.f32 %v1430_v36, %v522_v44 }
  0xd2   :  { %v1166_v49 = vpop.f32.mrf.mxu0  ;;  %v1198_v50 = vpop.f32.mrf.mxu1 }
  0xd3   :  { %vm790_vm2 = vcmp.ge.f32.partialorder %v726_v45, 0.0  ;;  %v858_v51 = vmul.f32 %v1442_v42, %v726_v45  ;;  %vm822_vm3 = vcmp.ge.f32.partialorder %v758_v46, 0.0  ;;  %v890_v52 = vmul.f32 %v1442_v42, %v758_v46 }
  0xd4   :  { %v724_v53 = vadd.f32 %v1435_v38, %v656_v47  ;;  %v756_v54 = vadd.f32 %v1435_v38, %v688_v48  ;;  %v659_v55 = vmul.f32 %v1166_v49, %v1430_v36  ;;  %v691_v56 = vmul.f32 %v1198_v50, %v1430_v36  ;;  %v397_v57 = vpop.f32.mrf.mxu0  ;;  %v525_v58 = vpop.f32.mrf.mxu1 }
  0xd5   :  { %v922_v59 = vsel %vm790_vm2, %v726_v45, %v858_v51  ;;  %v954_v60 = vsel %vm822_vm3, %v758_v46, %v890_v52  ;;  %v657_v61 = vmul.f32 %v1430_v36, %v397_v57  ;;  %v689_v62 = vmul.f32 %v1430_v36, %v525_v58 }
  0xd6   :  { %986 = vst [vmem:[%s1850_s3 + $0x10] sm:$0xff] %v922_v59  ;;  %1018 = vst [vmem:[%s1850_s3 + $0x110] sm:$0xff] %v954_v60  ;;  %vm788_vm4 = vcmp.ge.f32.partialorder %v724_v53, 0.0  ;;  %v856_v63 = vmul.f32 %v1442_v42, %v724_v53  ;;  %vm820_vm5 = vcmp.ge.f32.partialorder %v756_v54, 0.0  ;;  %v888_v0 = vmul.f32 %v1442_v42, %v756_v54  ;;  %v1169_v1 = vpop.f32.mrf.mxu0  ;;  %v1201_v2 = vpop.f32.mrf.mxu1 }
  0xd7   :  { %v727_v3 = vadd.f32 %v1435_v38, %v659_v55  ;;  %v759_v4 = vadd.f32 %v1435_v38, %v691_v56  ;;  %v725_v5 = vadd.f32 %v1435_v38, %v657_v61  ;;  %v757_v6 = vadd.f32 %v1435_v38, %v689_v62 }
  0xd8   :  { %v920_v7 = vsel %vm788_vm4, %v724_v53, %v856_v63  ;;  %v952_v8 = vsel %vm820_vm5, %v756_v54, %v888_v0  ;;  %v662_v9 = vmul.f32 %v1169_v1, %v1430_v36  ;;  %v694_v10 = vmul.f32 %v1201_v2, %v1430_v36  ;;  %v410_v11 = vpop.f32.mrf.mxu0  ;;  %v538_v12 = vpop.f32.mrf.mxu1 }
  0xd9   :  { %984 = vst [vmem:[%s1850_s3] sm:$0xff] %v920_v7  ;;  %1016 = vst [vmem:[%s1850_s3 + $0x100] sm:$0xff] %v952_v8  ;;  %vm791_vm6 = vcmp.ge.f32.partialorder %v727_v3, 0.0  ;;  %v859_v13 = vmul.f32 %v1442_v42, %v727_v3  ;;  %vm823_vm7 = vcmp.ge.f32.partialorder %v759_v4, 0.0  ;;  %v891_v14 = vmul.f32 %v1442_v42, %v759_v4 }
  0xda   :  { %vm789_vm8 = vcmp.ge.f32.partialorder %v725_v5, 0.0  ;;  %v857_v15 = vmul.f32 %v1442_v42, %v725_v5  ;;  %vm821_vm9 = vcmp.ge.f32.partialorder %v757_v6, 0.0  ;;  %v889_v16 = vmul.f32 %v1442_v42, %v757_v6  ;;  %v1170_v17 = vpop.f32.mrf.mxu0  ;;  %v1202_v18 = vpop.f32.mrf.mxu1 }
  0xdb   :  { %v923_v19 = vsel %vm791_vm6, %v727_v3, %v859_v13  ;;  %v955_v20 = vsel %vm823_vm7, %v759_v4, %v891_v14  ;;  %v730_v21 = vadd.f32 %v1435_v38, %v662_v9  ;;  %v762_v22 = vadd.f32 %v1435_v38, %v694_v10 }
  0xdc   :  { %987 = vst [vmem:[%s1850_s3 + $0x18] sm:$0xff] %v923_v19  ;;  %1019 = vst [vmem:[%s1850_s3 + $0x118] sm:$0xff] %v955_v20  ;;  %v921_v23 = vsel %vm789_vm8, %v725_v5, %v857_v15  ;;  %v953_v24 = vsel %vm821_vm9, %v757_v6, %v889_v16  ;;  %v660_v25 = vmul.f32 %v1430_v36, %v410_v11  ;;  %v413_v27 = vpop.f32.mrf.mxu0  ;;  %v541_v28 = vpop.f32.mrf.mxu1 }
  0xdd   :  { %v692_v26 = vmul.f32 %v1430_v36, %v538_v12  ;;  %985 = vst [vmem:[%s1850_s3 + $0x8] sm:$0xff] %v921_v23  ;;  %1017 = vst [vmem:[%s1850_s3 + $0x108] sm:$0xff] %v953_v24  ;;  %vm794_vm10 = vcmp.ge.f32.partialorder %v730_v21, 0.0  ;;  %v862_v29 = vmul.f32 %v1442_v42, %v730_v21  ;;  %vm826_vm11 = vcmp.ge.f32.partialorder %v762_v22, 0.0 }
  0xde   :  { %v894_v30 = vmul.f32 %v1442_v42, %v762_v22  ;;  %v728_v31 = vadd.f32 %v1435_v38, %v660_v25  ;;  %v663_v33 = vmul.f32 %v1170_v17, %v1430_v36  ;;  %v695_v34 = vmul.f32 %v1202_v18, %v1430_v36  ;;  %v1173_v35 = vpop.f32.mrf.mxu0  ;;  %v1205_v37 = vpop.f32.mrf.mxu1 }
  0xdf   :  { %v760_v32 = vadd.f32 %v1435_v38, %v692_v26  ;;  %v926_v39 = vsel %vm794_vm10, %v730_v21, %v862_v29  ;;  %v661_v41 = vmul.f32 %v1430_v36, %v413_v27  ;;  %v693_v43 = vmul.f32 %v1430_v36, %v541_v28 }
  0xe0   :  { %v958_v40 = vsel %vm826_vm11, %v762_v22, %v894_v30  ;;  %990 = vst [vmem:[%s1850_s3 + $0x30] sm:$0xff] %v926_v39  ;;  %vm792_vm12 = vcmp.ge.f32.partialorder %v728_v31, 0.0  ;;  %v860_v44 = vmul.f32 %v1442_v42, %v728_v31  ;;  %v426_v46 = vpop.f32.mrf.mxu0  ;;  %v554_v47 = vpop.f32.mrf.mxu1  ;;  %v731_v48 = vadd.f32 %v1435_v38, %v663_v33 }
  0xe1   :  { %1022 = vst [vmem:[%s1850_s3 + $0x130] sm:$0xff] %v958_v40  ;;  %vm824_vm13 = vcmp.ge.f32.partialorder %v760_v32, 0.0  ;;  %v892_v45 = vmul.f32 %v1442_v42, %v760_v32  ;;  %v763_v49 = vadd.f32 %v1435_v38, %v695_v34  ;;  %v729_v50 = vadd.f32 %v1435_v38, %v661_v41 }
  0xe2   :  { %v761_v51 = vadd.f32 %v1435_v38, %v693_v43  ;;  %v924_v52 = vsel %vm792_vm12, %v728_v31, %v860_v44  ;;  %v666_v54 = vmul.f32 %v1173_v35, %v1430_v36  ;;  %v698_v55 = vmul.f32 %v1205_v37, %v1430_v36  ;;  %v1174_v56 = vpop.f32.mrf.mxu0  ;;  %v1206_v57 = vpop.f32.mrf.mxu1 }
  0xe3   :  { %v956_v53 = vsel %vm824_vm13, %v760_v32, %v892_v45  ;;  %988 = vst [vmem:[%s1850_s3 + $0x20] sm:$0xff] %v924_v52  ;;  %vm795_vm14 = vcmp.ge.f32.partialorder %v731_v48, 0.0  ;;  %v863_v58 = vmul.f32 %v1442_v42, %v731_v48  ;;  %vm827_vm15 = vcmp.ge.f32.partialorder %v763_v49, 0.0 }
  0xe4   :  { %1020 = vst [vmem:[%s1850_s3 + $0x120] sm:$0xff] %v956_v53  ;;  %v895_v59 = vmul.f32 %v1442_v42, %v763_v49  ;;  %vm793_vm0 = vcmp.ge.f32.partialorder %v729_v50, 0.0  ;;  %v861_v60 = vmul.f32 %v1442_v42, %v729_v50  ;;  %vm825_vm1 = vcmp.ge.f32.partialorder %v761_v51, 0.0  ;;  %v429_v62 = vpop.f32.mrf.mxu0  ;;  %v557_v63 = vpop.f32.mrf.mxu1 }
  0xe5   :  { %v893_v61 = vmul.f32 %v1442_v42, %v761_v51  ;;  %v927_v0 = vsel %vm795_vm14, %v731_v48, %v863_v58  ;;  %v734_v2 = vadd.f32 %v1435_v38, %v666_v54  ;;  %v766_v3 = vadd.f32 %v1435_v38, %v698_v55 }
  0xe6   :  { %v959_v1 = vsel %vm827_vm15, %v763_v49, %v895_v59  ;;  %991 = vst [vmem:[%s1850_s3 + $0x38] sm:$0xff] %v927_v0  ;;  %v925_v4 = vsel %vm793_vm0, %v729_v50, %v861_v60  ;;  %v664_v6 = vmul.f32 %v1430_v36, %v426_v46  ;;  %v696_v7 = vmul.f32 %v1430_v36, %v554_v47  ;;  %v1177_v8 = vpop.f32.mrf.mxu0  ;;  %v1209_v9 = vpop.f32.mrf.mxu1 }
  0xe7   :  { %1023 = vst [vmem:[%s1850_s3 + $0x138] sm:$0xff] %v959_v1  ;;  %v957_v5 = vsel %vm825_vm1, %v761_v51, %v893_v61  ;;  %989 = vst [vmem:[%s1850_s3 + $0x28] sm:$0xff] %v925_v4  ;;  %vm798_vm2 = vcmp.ge.f32.partialorder %v734_v2, 0.0  ;;  %v866_v10 = vmul.f32 %v1442_v42, %v734_v2  ;;  %vm830_vm3 = vcmp.ge.f32.partialorder %v766_v3, 0.0 }
  0xe8   :  { %1021 = vst [vmem:[%s1850_s3 + $0x128] sm:$0xff] %v957_v5  ;;  %v898_v11 = vmul.f32 %v1442_v42, %v766_v3  ;;  %v732_v12 = vadd.f32 %v1435_v38, %v664_v6  ;;  %v764_v13 = vadd.f32 %v1435_v38, %v696_v7  ;;  %v667_v14 = vmul.f32 %v1174_v56, %v1430_v36  ;;  %v442_v16 = vpop.f32.mrf.mxu0  ;;  %v570_v17 = vpop.f32.mrf.mxu1 }
  0xe9   :  { %v699_v15 = vmul.f32 %v1206_v57, %v1430_v36  ;;  %v930_v18 = vsel %vm798_vm2, %v734_v2, %v866_v10  ;;  %v665_v20 = vmul.f32 %v1430_v36, %v429_v62  ;;  %v697_v21 = vmul.f32 %v1430_v36, %v557_v63 }
  0xea   :  { %v962_v19 = vsel %vm830_vm3, %v766_v3, %v898_v11  ;;  %994 = vst [vmem:[%s1850_s3 + $0x50] sm:$0xff] %v930_v18  ;;  %vm796_vm4 = vcmp.ge.f32.partialorder %v732_v12, 0.0  ;;  %v864_v22 = vmul.f32 %v1442_v42, %v732_v12  ;;  %vm828_vm5 = vcmp.ge.f32.partialorder %v764_v13, 0.0  ;;  %v1178_v24 = vpop.f32.mrf.mxu0  ;;  %v1210_v25 = vpop.f32.mrf.mxu1 }
  0xeb   :  { %1026 = vst [vmem:[%s1850_s3 + $0x150] sm:$0xff] %v962_v19  ;;  %v896_v23 = vmul.f32 %v1442_v42, %v764_v13  ;;  %v735_v26 = vadd.f32 %v1435_v38, %v667_v14  ;;  %v767_v27 = vadd.f32 %v1435_v38, %v699_v15  ;;  %v733_v28 = vadd.f32 %v1435_v38, %v665_v20 }
  0xec   :  { %v765_v29 = vadd.f32 %v1435_v38, %v697_v21  ;;  %v928_v30 = vsel %vm796_vm4, %v732_v12, %v864_v22  ;;  %v670_v32 = vmul.f32 %v1177_v8, %v1430_v36  ;;  %v702_v33 = vmul.f32 %v1209_v9, %v1430_v36  ;;  %v445_v34 = vpop.f32.mrf.mxu0  ;;  %v573_v35 = vpop.f32.mrf.mxu1 }
  0xed   :  { %v960_v31 = vsel %vm828_vm5, %v764_v13, %v896_v23  ;;  %992 = vst [vmem:[%s1850_s3 + $0x40] sm:$0xff] %v928_v30  ;;  %vm799_vm6 = vcmp.ge.f32.partialorder %v735_v26, 0.0  ;;  %v867_v37 = vmul.f32 %v1442_v42, %v735_v26  ;;  %vm831_vm7 = vcmp.ge.f32.partialorder %v767_v27, 0.0 }
  0xee   :  { %1024 = vst [vmem:[%s1850_s3 + $0x140] sm:$0xff] %v960_v31  ;;  %v899_v39 = vmul.f32 %v1442_v42, %v767_v27  ;;  %vm797_vm8 = vcmp.ge.f32.partialorder %v733_v28, 0.0  ;;  %v865_v40 = vmul.f32 %v1442_v42, %v733_v28  ;;  %vm829_vm9 = vcmp.ge.f32.partialorder %v765_v29, 0.0  ;;  %v1181_v43 = vpop.f32.mrf.mxu0  ;;  %v1213_v44 = vpop.f32.mrf.mxu1 }
  0xef   :  { %v897_v41 = vmul.f32 %v1442_v42, %v765_v29  ;;  %v931_v45 = vsel %vm799_vm6, %v735_v26, %v867_v37  ;;  %v738_v47 = vadd.f32 %v1435_v38, %v670_v32  ;;  %v770_v48 = vadd.f32 %v1435_v38, %v702_v33 }
  0xf0   :  { %v963_v46 = vsel %vm831_vm7, %v767_v27, %v899_v39  ;;  %995 = vst [vmem:[%s1850_s3 + $0x58] sm:$0xff] %v931_v45  ;;  %v929_v49 = vsel %vm797_vm8, %v733_v28, %v865_v40  ;;  %v668_v51 = vmul.f32 %v1430_v36, %v442_v16  ;;  %v700_v52 = vmul.f32 %v1430_v36, %v570_v17  ;;  %v458_v53 = vpop.f32.mrf.mxu0  ;;  %v586_v54 = vpop.f32.mrf.mxu1 }
  0xf1   :  { %1027 = vst [vmem:[%s1850_s3 + $0x158] sm:$0xff] %v963_v46  ;;  %v961_v50 = vsel %vm829_vm9, %v765_v29, %v897_v41  ;;  %993 = vst [vmem:[%s1850_s3 + $0x48] sm:$0xff] %v929_v49  ;;  %vm802_vm10 = vcmp.ge.f32.partialorder %v738_v47, 0.0  ;;  %v870_v55 = vmul.f32 %v1442_v42, %v738_v47  ;;  %vm834_vm11 = vcmp.ge.f32.partialorder %v770_v48, 0.0 }
  0xf2   :  { %1025 = vst [vmem:[%s1850_s3 + $0x148] sm:$0xff] %v961_v50  ;;  %v902_v56 = vmul.f32 %v1442_v42, %v770_v48  ;;  %v736_v57 = vadd.f32 %v1435_v38, %v668_v51  ;;  %v768_v58 = vadd.f32 %v1435_v38, %v700_v52  ;;  %v671_v59 = vmul.f32 %v1178_v24, %v1430_v36  ;;  %v1182_v61 = vpop.f32.mrf.mxu0  ;;  %v1214_v62 = vpop.f32.mrf.mxu1 }
  0xf3   :  { %v703_v60 = vmul.f32 %v1210_v25, %v1430_v36  ;;  %v934_v63 = vsel %vm802_vm10, %v738_v47, %v870_v55  ;;  %v669_v1 = vmul.f32 %v1430_v36, %v445_v34  ;;  %v701_v2 = vmul.f32 %v1430_v36, %v573_v35 }
  0xf4   :  { %v966_v0 = vsel %vm834_vm11, %v770_v48, %v902_v56  ;;  %998 = vst [vmem:[%s1850_s3 + $0x70] sm:$0xff] %v934_v63  ;;  %vm800_vm12 = vcmp.ge.f32.partialorder %v736_v57, 0.0  ;;  %v868_v3 = vmul.f32 %v1442_v42, %v736_v57  ;;  %vm832_vm13 = vcmp.ge.f32.partialorder %v768_v58, 0.0  ;;  %v461_v5 = vpop.f32.mrf.mxu0  ;;  %v589_v6 = vpop.f32.mrf.mxu1 }
  0xf5   :  { %1030 = vst [vmem:[%s1850_s3 + $0x170] sm:$0xff] %v966_v0  ;;  %v900_v4 = vmul.f32 %v1442_v42, %v768_v58  ;;  %v739_v7 = vadd.f32 %v1435_v38, %v671_v59  ;;  %v771_v8 = vadd.f32 %v1435_v38, %v703_v60  ;;  %v737_v9 = vadd.f32 %v1435_v38, %v669_v1 }
  0xf6   :  { %v769_v10 = vadd.f32 %v1435_v38, %v701_v2  ;;  %v932_v11 = vsel %vm800_vm12, %v736_v57, %v868_v3  ;;  %v674_v13 = vmul.f32 %v1181_v43, %v1430_v36  ;;  %v706_v14 = vmul.f32 %v1213_v44, %v1430_v36  ;;  %v1185_v15 = vpop.f32.mrf.mxu0  ;;  %v1217_v16 = vpop.f32.mrf.mxu1 }
  0xf7   :  { %v964_v12 = vsel %vm832_vm13, %v768_v58, %v900_v4  ;;  %996 = vst [vmem:[%s1850_s3 + $0x60] sm:$0xff] %v932_v11  ;;  %vm803_vm14 = vcmp.ge.f32.partialorder %v739_v7, 0.0  ;;  %v871_v17 = vmul.f32 %v1442_v42, %v739_v7  ;;  %vm835_vm15 = vcmp.ge.f32.partialorder %v771_v8, 0.0 }
  0xf8   :  { %1028 = vst [vmem:[%s1850_s3 + $0x160] sm:$0xff] %v964_v12  ;;  %v903_v18 = vmul.f32 %v1442_v42, %v771_v8  ;;  %vm801_vm0 = vcmp.ge.f32.partialorder %v737_v9, 0.0  ;;  %v869_v19 = vmul.f32 %v1442_v42, %v737_v9  ;;  %vm833_vm1 = vcmp.ge.f32.partialorder %v769_v10, 0.0  ;;  %v1624_v21 = vpop.f32.mrf.mxu0  ;;  %v1626_v22 = vpop.f32.mrf.mxu1 }
  0xf9   :  { %v901_v20 = vmul.f32 %v1442_v42, %v769_v10  ;;  %v935_v23 = vsel %vm803_vm14, %v739_v7, %v871_v17  ;;  %v742_v25 = vadd.f32 %v1435_v38, %v674_v13  ;;  %v774_v26 = vadd.f32 %v1435_v38, %v706_v14 }
  0xfa   :  { %v967_v24 = vsel %vm835_vm15, %v771_v8, %v903_v18  ;;  %999 = vst [vmem:[%s1850_s3 + $0x78] sm:$0xff] %v935_v23  ;;  %v933_v27 = vsel %vm801_vm0, %v737_v9, %v869_v19  ;;  %v672_v29 = vmul.f32 %v1430_v36, %v458_v53  ;;  %v704_v30 = vmul.f32 %v1430_v36, %v586_v54  ;;  %v1638_v31 = vpop.f32.mrf.mxu0  ;;  %v1640_v32 = vpop.f32.mrf.mxu1 }
  0xfb   :  { %1031 = vst [vmem:[%s1850_s3 + $0x178] sm:$0xff] %v967_v24  ;;  %v965_v28 = vsel %vm833_vm1, %v769_v10, %v901_v20  ;;  %997 = vst [vmem:[%s1850_s3 + $0x68] sm:$0xff] %v933_v27  ;;  %vm806_vm2 = vcmp.ge.f32.partialorder %v742_v25, 0.0  ;;  %v874_v33 = vmul.f32 %v1442_v42, %v742_v25  ;;  %vm838_vm3 = vcmp.ge.f32.partialorder %v774_v26, 0.0 }
  0xfc   :  { %1029 = vst [vmem:[%s1850_s3 + $0x168] sm:$0xff] %v965_v28  ;;  %v906_v34 = vmul.f32 %v1442_v42, %v774_v26  ;;  %v740_v35 = vadd.f32 %v1435_v38, %v672_v29  ;;  %v772_v37 = vadd.f32 %v1435_v38, %v704_v30  ;;  %v675_v39 = vmul.f32 %v1182_v61, %v1430_v36  ;;  %v477_v41 = vpop.f32.mrf.mxu0  ;;  %v605_v43 = vpop.f32.mrf.mxu1 }
  0xfd   :  { %v707_v40 = vmul.f32 %v1214_v62, %v1430_v36  ;;  %v938_v44 = vsel %vm806_vm2, %v742_v25, %v874_v33  ;;  %v673_v46 = vmul.f32 %v1430_v36, %v461_v5  ;;  %v705_v47 = vmul.f32 %v1430_v36, %v589_v6 }
  0xfe   :  { %v970_v45 = vsel %vm838_vm3, %v774_v26, %v906_v34  ;;  %1002 = vst [vmem:[%s1850_s3 + $0x90] sm:$0xff] %v938_v44  ;;  %vm804_vm4 = vcmp.ge.f32.partialorder %v740_v35, 0.0  ;;  %v872_v48 = vmul.f32 %v1442_v42, %v740_v35  ;;  %vm836_vm5 = vcmp.ge.f32.partialorder %v772_v37, 0.0  ;;  %v1664_v50 = vpop.f32.mrf.mxu0  ;;  %v1221_v51 = vpop.f32.mrf.mxu1 }
  0xff   :  { %1034 = vst [vmem:[%s1850_s3 + $0x190] sm:$0xff] %v970_v45  ;;  %v904_v49 = vmul.f32 %v1442_v42, %v772_v37  ;;  %v743_v52 = vadd.f32 %v1435_v38, %v675_v39  ;;  %v775_v53 = vadd.f32 %v1435_v38, %v707_v40  ;;  %v741_v54 = vadd.f32 %v1435_v38, %v673_v46 }
 0x100   :  { %v773_v55 = vadd.f32 %v1435_v38, %v705_v47  ;;  %v936_v56 = vsel %vm804_vm4, %v740_v35, %v872_v48  ;;  %v678_v58 = vmul.f32 %v1185_v15, %v1430_v36  ;;  %v710_v59 = vmul.f32 %v1217_v16, %v1430_v36  ;;  %v1672_v60 = vpop.f32.mrf.mxu0  ;;  %v1674_v61 = vpop.f32.mrf.mxu1 }
 0x101   :  { %v968_v57 = vsel %vm836_vm5, %v772_v37, %v904_v49  ;;  %1000 = vst [vmem:[%s1850_s3 + $0x80] sm:$0xff] %v936_v56  ;;  %vm807_vm6 = vcmp.ge.f32.partialorder %v743_v52, 0.0  ;;  %v875_v62 = vmul.f32 %v1442_v42, %v743_v52  ;;  %vm839_vm7 = vcmp.ge.f32.partialorder %v775_v53, 0.0 }
 0x102   :  { %1032 = vst [vmem:[%s1850_s3 + $0x180] sm:$0xff] %v968_v57  ;;  %v907_v63 = vmul.f32 %v1442_v42, %v775_v53  ;;  %vm805_vm8 = vcmp.ge.f32.partialorder %v741_v54, 0.0  ;;  %v873_v0 = vmul.f32 %v1442_v42, %v741_v54  ;;  %vm837_vm9 = vcmp.ge.f32.partialorder %v773_v55, 0.0  ;;  %v1190_v10 = vpop.f32.mrf.mxu0  ;;  %v1222_v11 = vpop.f32.mrf.mxu1 }
 0x103   :  { %v905_v1 = vmul.f32 %v1442_v42, %v773_v55  ;;  %v939_v2 = vsel %vm807_vm6, %v743_v52, %v875_v62  ;;  %v746_v4 = vadd.f32 %v1435_v38, %v678_v58  ;;  %v778_v5 = vadd.f32 %v1435_v38, %v710_v59 }
 0x104   :  { %v971_v3 = vsel %vm839_vm7, %v775_v53, %v907_v63  ;;  %1003 = vst [vmem:[%s1850_s3 + $0x98] sm:$0xff] %v939_v2  ;;  %v937_v6 = vsel %vm805_vm8, %v741_v54, %v873_v0  ;;  %v676_v8 = vmul.f32 %v1430_v36, %v1624_v21  ;;  %v708_v9 = vmul.f32 %v1430_v36, %v1626_v22  ;;  %v493_v24 = vpop.f32.mrf.mxu0  ;;  %v621_v25 = vpop.f32.mrf.mxu1 }
 0x105   :  { %1035 = vst [vmem:[%s1850_s3 + $0x198] sm:$0xff] %v971_v3  ;;  %v969_v7 = vsel %vm837_vm9, %v773_v55, %v905_v1  ;;  %1001 = vst [vmem:[%s1850_s3 + $0x88] sm:$0xff] %v937_v6  ;;  %vm810_vm10 = vcmp.ge.f32.partialorder %v746_v4, 0.0  ;;  %v878_v12 = vmul.f32 %v1442_v42, %v746_v4  ;;  %vm842_vm11 = vcmp.ge.f32.partialorder %v778_v5, 0.0 }
 0x106   :  { %1033 = vst [vmem:[%s1850_s3 + $0x188] sm:$0xff] %v969_v7  ;;  %v910_v13 = vmul.f32 %v1442_v42, %v778_v5  ;;  %v744_v14 = vadd.f32 %v1435_v38, %v676_v8  ;;  %v776_v15 = vadd.f32 %v1435_v38, %v708_v9  ;;  %v679_v16 = vmul.f32 %v1638_v31, %v1430_v36  ;;  %v1193_v40 = vpop.f32.mrf.mxu0 }
 0x107   :  { %v711_v17 = vmul.f32 %v1640_v32, %v1430_v36  ;;  %v942_v18 = vsel %vm810_vm10, %v746_v4, %v878_v12  ;;  %v677_v20 = vmul.f32 %v1430_v36, %v477_v41  ;;  %v709_v21 = vmul.f32 %v1430_v36, %v605_v43  ;;  %v1225_v41 = vpop.f32.mrf.mxu1 }
 0x108   :  { %v974_v19 = vsel %vm842_vm11, %v778_v5, %v910_v13  ;;  %1006 = vst [vmem:[%s1850_s3 + $0xb0] sm:$0xff] %v942_v18  ;;  %vm808_vm12 = vcmp.ge.f32.partialorder %v744_v14, 0.0  ;;  %v876_v22 = vmul.f32 %v1442_v42, %v744_v14  ;;  %vm840_vm13 = vcmp.ge.f32.partialorder %v776_v15, 0.0  ;;  %v506_v57 = vpop.f32.mrf.mxu0 }
 0x109   :  { %1038 = vst [vmem:[%s1850_s3 + $0x1b0] sm:$0xff] %v974_v19  ;;  %v908_v23 = vmul.f32 %v1442_v42, %v776_v15  ;;  %v747_v26 = vadd.f32 %v1435_v38, %v679_v16  ;;  %v779_v27 = vadd.f32 %v1435_v38, %v711_v17  ;;  %v745_v28 = vadd.f32 %v1435_v38, %v677_v20  ;;  %v634_v58 = vpop.f32.mrf.mxu1 }
 0x10a   :  { %v777_v29 = vadd.f32 %v1435_v38, %v709_v21  ;;  %v940_v30 = vsel %vm808_vm12, %v744_v14, %v876_v22  ;;  %v682_v32 = vmul.f32 %v1664_v50, %v1430_v36  ;;  %v714_v33 = vmul.f32 %v1221_v51, %v1430_v36  ;;  %v1194_v9 = vpop.f32.mrf.mxu0 }
 0x10b   :  { %v972_v31 = vsel %vm840_vm13, %v776_v15, %v908_v23  ;;  %1004 = vst [vmem:[%s1850_s3 + $0xa0] sm:$0xff] %v940_v30  ;;  %vm811_vm14 = vcmp.ge.f32.partialorder %v747_v26, 0.0  ;;  %v879_v34 = vmul.f32 %v1442_v42, %v747_v26  ;;  %vm843_vm15 = vcmp.ge.f32.partialorder %v779_v27, 0.0 }
 0x10c   :  { %1036 = vst [vmem:[%s1850_s3 + $0x1a0] sm:$0xff] %v972_v31  ;;  %v911_v35 = vmul.f32 %v1442_v42, %v779_v27  ;;  %vm809_vm0 = vcmp.ge.f32.partialorder %v745_v28, 0.0  ;;  %v877_v37 = vmul.f32 %v1442_v42, %v745_v28  ;;  %vm841_vm1 = vcmp.ge.f32.partialorder %v777_v29, 0.0  ;;  %v509_v23 = vpop.f32.mrf.mxu0 }
 0x10d   :  { %v909_v39 = vmul.f32 %v1442_v42, %v777_v29  ;;  %v943_v43 = vsel %vm811_vm14, %v747_v26, %v879_v34  ;;  %v750_v45 = vadd.f32 %v1435_v38, %v682_v32  ;;  %v782_v46 = vadd.f32 %v1435_v38, %v714_v33 }
 0x10e   :  { %v975_v44 = vsel %vm843_vm15, %v779_v27, %v911_v35  ;;  %1007 = vst [vmem:[%s1850_s3 + $0xb8] sm:$0xff] %v943_v43  ;;  %v941_v47 = vsel %vm809_vm0, %v745_v28, %v877_v37  ;;  %v680_v49 = vmul.f32 %v1430_v36, %v1672_v60  ;;  %v712_v50 = vmul.f32 %v1430_v36, %v1674_v61 }
 0x10f   :  { %1039 = vst [vmem:[%s1850_s3 + $0x1b8] sm:$0xff] %v975_v44  ;;  %v973_v48 = vsel %vm841_vm1, %v777_v29, %v909_v39  ;;  %1005 = vst [vmem:[%s1850_s3 + $0xa8] sm:$0xff] %v941_v47  ;;  %vm814_vm2 = vcmp.ge.f32.partialorder %v750_v45, 0.0  ;;  %v882_v51 = vmul.f32 %v1442_v42, %v750_v45  ;;  %vm846_vm3 = vcmp.ge.f32.partialorder %v782_v46, 0.0 }
 0x110   :  { %1037 = vst [vmem:[%s1850_s3 + $0x1a8] sm:$0xff] %v973_v48  ;;  %v914_v52 = vmul.f32 %v1442_v42, %v782_v46  ;;  %v748_v53 = vadd.f32 %v1435_v38, %v680_v49  ;;  %v780_v54 = vadd.f32 %v1435_v38, %v712_v50  ;;  %v683_v55 = vmul.f32 %v1190_v10, %v1430_v36  ;;  %v1226_v10 = vpop.f32.mrf.mxu1 }
 0x111   :  { %v715_v56 = vmul.f32 %v1222_v11, %v1430_v36  ;;  %v946_v59 = vsel %vm814_vm2, %v750_v45, %v882_v51  ;;  %v681_v61 = vmul.f32 %v1430_v36, %v493_v24  ;;  %v713_v62 = vmul.f32 %v1430_v36, %v621_v25 }
 0x112   :  { %v978_v60 = vsel %vm846_vm3, %v782_v46, %v914_v52  ;;  %1010 = vst [vmem:[%s1850_s3 + $0xd0] sm:$0xff] %v946_v59  ;;  %vm812_vm4 = vcmp.ge.f32.partialorder %v748_v53, 0.0  ;;  %v880_v63 = vmul.f32 %v1442_v42, %v748_v53  ;;  %vm844_vm5 = vcmp.ge.f32.partialorder %v780_v54, 0.0  ;;  %v637_v24 = vpop.f32.mrf.mxu1 }
 0x113   :  { %1042 = vst [vmem:[%s1850_s3 + $0x1d0] sm:$0xff] %v978_v60  ;;  %v912_v0 = vmul.f32 %v1442_v42, %v780_v54  ;;  %v751_v1 = vadd.f32 %v1435_v38, %v683_v55  ;;  %v783_v2 = vadd.f32 %v1435_v38, %v715_v56  ;;  %v749_v3 = vadd.f32 %v1435_v38, %v681_v61 }
 0x114   :  { %v781_v4 = vadd.f32 %v1435_v38, %v713_v62  ;;  %v944_v5 = vsel %vm812_vm4, %v748_v53, %v880_v63  ;;  %v686_v7 = vmul.f32 %v1193_v40, %v1430_v36  ;;  %v718_v8 = vmul.f32 %v1225_v41, %v1430_v36 }
 0x115   :  { %v976_v6 = vsel %vm844_vm5, %v780_v54, %v912_v0  ;;  %1008 = vst [vmem:[%s1850_s3 + $0xc0] sm:$0xff] %v944_v5  ;;  %vm815_vm6 = vcmp.ge.f32.partialorder %v751_v1, 0.0  ;;  %v883_v11 = vmul.f32 %v1442_v42, %v751_v1  ;;  %vm847_vm7 = vcmp.ge.f32.partialorder %v783_v2, 0.0 }
 0x116   :  { %1040 = vst [vmem:[%s1850_s3 + $0x1c0] sm:$0xff] %v976_v6  ;;  %v915_v12 = vmul.f32 %v1442_v42, %v783_v2  ;;  %vm813_vm8 = vcmp.ge.f32.partialorder %v749_v3, 0.0  ;;  %v881_v13 = vmul.f32 %v1442_v42, %v749_v3  ;;  %vm845_vm9 = vcmp.ge.f32.partialorder %v781_v4, 0.0 }
 0x117   :  { %v913_v14 = vmul.f32 %v1442_v42, %v781_v4  ;;  %v947_v15 = vsel %vm815_vm6, %v751_v1, %v883_v11  ;;  %v754_v17 = vadd.f32 %v1435_v38, %v686_v7  ;;  %v786_v18 = vadd.f32 %v1435_v38, %v718_v8 }
 0x118   :  { %v979_v16 = vsel %vm847_vm7, %v783_v2, %v915_v12  ;;  %1011 = vst [vmem:[%s1850_s3 + $0xd8] sm:$0xff] %v947_v15  ;;  %v945_v19 = vsel %vm813_vm8, %v749_v3, %v881_v13  ;;  %v684_v21 = vmul.f32 %v1430_v36, %v506_v57  ;;  %v716_v22 = vmul.f32 %v1430_v36, %v634_v58 }
 0x119   :  { %1043 = vst [vmem:[%s1850_s3 + $0x1d8] sm:$0xff] %v979_v16  ;;  %v977_v20 = vsel %vm845_vm9, %v781_v4, %v913_v14  ;;  %1009 = vst [vmem:[%s1850_s3 + $0xc8] sm:$0xff] %v945_v19  ;;  %vm818_vm10 = vcmp.ge.f32.partialorder %v754_v17, 0.0  ;;  %v886_v25 = vmul.f32 %v1442_v42, %v754_v17  ;;  %vm850_vm11 = vcmp.ge.f32.partialorder %v786_v18, 0.0 }
 0x11a   :  { %1041 = vst [vmem:[%s1850_s3 + $0x1c8] sm:$0xff] %v977_v20  ;;  %v918_v26 = vmul.f32 %v1442_v42, %v786_v18  ;;  %v752_v27 = vadd.f32 %v1435_v38, %v684_v21  ;;  %v784_v28 = vadd.f32 %v1435_v38, %v716_v22  ;;  %v687_v29 = vmul.f32 %v1194_v9, %v1430_v36 }
 0x11b   :  { %v719_v30 = vmul.f32 %v1226_v10, %v1430_v36  ;;  %v950_v31 = vsel %vm818_vm10, %v754_v17, %v886_v25  ;;  %v685_v33 = vmul.f32 %v1430_v36, %v509_v23  ;;  %v717_v34 = vmul.f32 %v1430_v36, %v637_v24 }
 0x11c   :  { %v982_v32 = vsel %vm850_vm11, %v786_v18, %v918_v26  ;;  %1014 = vst [vmem:[%s1850_s3 + $0xf0] sm:$0xff] %v950_v31  ;;  %vm816_vm12 = vcmp.ge.f32.partialorder %v752_v27, 0.0  ;;  %v884_v35 = vmul.f32 %v1442_v42, %v752_v27  ;;  %vm848_vm13 = vcmp.ge.f32.partialorder %v784_v28, 0.0 }
 0x11d   :  { %1046 = vst [vmem:[%s1850_s3 + $0x1f0] sm:$0xff] %v982_v32  ;;  %v916_v37 = vmul.f32 %v1442_v42, %v784_v28  ;;  %v755_v39 = vadd.f32 %v1435_v38, %v687_v29  ;;  %v787_v40 = vadd.f32 %v1435_v38, %v719_v30  ;;  %v753_v36 = vadd.f32 %v1435_v38, %v685_v33 }
 0x11e   :  { %v785_v41 = vadd.f32 %v1435_v38, %v717_v34  ;;  %v948_v43 = vsel %vm816_vm12, %v752_v27, %v884_v35 }
 0x11f   :  { %v980_v44 = vsel %vm848_vm13, %v784_v28, %v916_v37  ;;  %1012 = vst [vmem:[%s1850_s3 + $0xe0] sm:$0xff] %v948_v43  ;;  %vm819_vm14 = vcmp.ge.f32.partialorder %v755_v39, 0.0  ;;  %v887_v45 = vmul.f32 %v1442_v42, %v755_v39  ;;  %vm851_vm15 = vcmp.ge.f32.partialorder %v787_v40, 0.0 }
 0x120   :  { %1044 = vst [vmem:[%s1850_s3 + $0x1e0] sm:$0xff] %v980_v44  ;;  %v919_v46 = vmul.f32 %v1442_v42, %v787_v40  ;;  %vm817_vm0 = vcmp.ge.f32.partialorder %v753_v36, 0.0  ;;  %v885_v47 = vmul.f32 %v1442_v42, %v753_v36  ;;  %vm849_vm1 = vcmp.ge.f32.partialorder %v785_v41, 0.0 }
 0x121   :  { %v917_v38 = vmul.f32 %v1442_v42, %v785_v41  ;;  %v951_v48 = vsel %vm819_vm14, %v755_v39, %v887_v45 }
 0x122   :  { %v983_v49 = vsel %vm851_vm15, %v787_v40, %v919_v46  ;;  %1015 = vst [vmem:[%s1850_s3 + $0xf8] sm:$0xff] %v951_v48  ;;  %v949_v50 = vsel %vm817_vm0, %v753_v36, %v885_v47 }
 0x123   :  { %1047 = vst [vmem:[%s1850_s3 + $0x1f8] sm:$0xff] %v983_v49  ;;  %v981_v51 = vsel %vm849_vm1, %v785_v41, %v917_v38  ;;  %1013 = vst [vmem:[%s1850_s3 + $0xe8] sm:$0xff] %v949_v50 }
 0x124   :  { %1045 = vst [vmem:[%s1850_s3 + $0x1e8] sm:$0xff] %v981_v51 }

// kernel: conv2d_pxp_forward.2
= control target key start
LH: loop header
LB: loop body
LE: loop exit
PB: predicated region body
PF: predicated region fallthrough
CT: control target
= control target key end

     0   :  { %vm361_vm0 = vcmask 1041408   ;;  %vm264_vm1 = vcmask 293888   ;;  %v1086_v37 = vmov 0.0   ;;  %s1342_s1 = inlined_call_operand.vmem [shape: bf16[36,128], index: 1, kind: input, shape index: {}]   ;;  %s1343_s0 = inlined_call_operand.vmem [shape: bf16[512,36], index: 0, kind: input, shape index: {}]   ;;  %s1344_s2 = inlined_call_operand.vmem [shape: f32[1,128], index: 2, kind: output, shape index: {0}]   ;;  %s1345_s3 = inlined_call_operand.vmem [shape: f32[1,128], index: 3, kind: output, shape index: {1}]  }
   0x1   :  { %v1051_v0 = vld [vmem:[%s1342_s1 + $0x10] ss:$0 sps:$4 sm:$0x33]   ;;  %v1052_v1 = vld [vmem:[%s1342_s1 + $0x8] sm:$0xff]   ;;  %v1054_v3 = vld [vmem:[%s1343_s0] sm:$0xff]   ;;  %18 = vst [vmem:[%s1344_s2] sm:$0x1] %v1086_v37 }
   0x2   :  { %1048 = vmatprep.subr.msk.bf16.mxu0 %vm361_vm0, %v1051_v0  ;;  %v363_v2 = vsel %vm361_vm0, %v1051_v0, 0  ;;  %1049 = vmatprep.subr.msk.bf16.mxu1 %vm361_vm0, %v1051_v0  ;;  %v1053_v4 = vld [vmem:[%s1342_s1] sm:$0xff]   ;;  %v1055_v5 = vld [vmem:[%s1343_s0 + $0x8] sm:$0xff]   ;;  %v1056_v6 = vld [vmem:[%s1343_s0 + $0x10] sm:$0xff]   ;;  %19 = vst [vmem:[%s1345_s3] sm:$0x1] %v1086_v37 }
   0x3   :  { %973 = vmatpush3.bf16.msra.mxu0 %v363_v2  ;;  %1045 = vmatpush3.bf16.msra.mxu1 %v363_v2  ;;  %v1057_v7 = vld [vmem:[%s1343_s0 + $0x18] sm:$0xff]   ;;  %v1058_v8 = vld [vmem:[%s1343_s0 + $0x20] sm:$0xff]   ;;  %v1071_v10 = vld [vmem:[%s1343_s0 + $0x88] sm:$0xff]  }
   0x4   :  { %974 = vmatprep.subr.bf16.mxu0 %v1052_v1  ;;  %1043 = vmatprep.subr.bf16.mxu1 %v1052_v1  ;;  %v1070_v9 = vld [vmem:[%s1343_s0 + $0x80] sm:$0xff]   ;;  %v1072_v11 = vld [vmem:[%s1343_s0 + $0x90] sm:$0xff]   ;;  %v1059_v12 = vld [vmem:[%s1343_s0 + $0x28] sm:$0xff]  }
   0x5   :  { %978 = vmatprep.mubr.msk.bf16.mxu0 %vm264_vm1, %v1054_v3  ;;  %1010 = vmatprep.mubr.msk.bf16.mxu1 %vm264_vm1, %v1070_v9  ;;  %v1060_v13 = vld [vmem:[%s1343_s0 + $0x30] sm:$0xff]   ;;  %v1073_v14 = vld [vmem:[%s1343_s0 + $0x98] sm:$0xff]   ;;  %v1074_v15 = vld [vmem:[%s1343_s0 + $0xa0] sm:$0xff]  }
   0x6   :  { %v1061_v16 = vld [vmem:[%s1343_s0 + $0x38] sm:$0xff]   ;;  %v1075_v17 = vld [vmem:[%s1343_s0 + $0xa8] sm:$0xff]   ;;  %v1062_v18 = vld [vmem:[%s1343_s0 + $0x40] sm:$0xff]  }
   0x7   :  { %975 = vmatpush3.bf16.msra.mxu0 %v1052_v1  ;;  %1046 = vmatpush3.bf16.msra.mxu1 %v1052_v1  ;;  %v1076_v19 = vld [vmem:[%s1343_s0 + $0xb0] sm:$0xff]   ;;  %v1063_v20 = vld [vmem:[%s1343_s0 + $0x48] sm:$0xff]   ;;  %v1077_v21 = vld [vmem:[%s1343_s0 + $0xb8] sm:$0xff]  }
   0x8   :  { %976 = vmatprep.subr.bf16.mxu0 %v1053_v4  ;;  %1044 = vmatprep.subr.bf16.mxu1 %v1053_v4  ;;  %v1064_v22 = vld [vmem:[%s1343_s0 + $0x50] sm:$0xff]   ;;  %v1078_v23 = vld [vmem:[%s1343_s0 + $0xc0] sm:$0xff]   ;;  %v1065_v24 = vld [vmem:[%s1343_s0 + $0x58] sm:$0xff]  }
   0x9   :  { %v1079_v25 = vld [vmem:[%s1343_s0 + $0xc8] sm:$0xff]   ;;  %v1066_v26 = vld [vmem:[%s1343_s0 + $0x60] sm:$0xff]   ;;  %v1080_v27 = vld [vmem:[%s1343_s0 + $0xd0] sm:$0xff]  }
   0xa   :  { %v1067_v28 = vld [vmem:[%s1343_s0 + $0x68] sm:$0xff]   ;;  %v1081_v29 = vld [vmem:[%s1343_s0 + $0xd8] sm:$0xff]   ;;  %v1068_v30 = vld [vmem:[%s1343_s0 + $0x70] sm:$0xff]  }
   0xb   :  { %977 = vmatpush3.bf16.msra.mxu0 %v1053_v4  ;;  %1047 = vmatpush3.bf16.msra.mxu1 %v1053_v4  ;;  %v1082_v31 = vld [vmem:[%s1343_s0 + $0xe0] sm:$0xff]   ;;  %v1069_v32 = vld [vmem:[%s1343_s0 + $0x78] sm:$0xff]   ;;  %v1083_v33 = vld [vmem:[%s1343_s0 + $0xe8] sm:$0xff]  }
   0xc   :  { %v1084_v34 = vld [vmem:[%s1343_s0 + $0xf0] sm:$0xff]   ;;  %v1085_v35 = vld [vmem:[%s1343_s0 + $0xf8] sm:$0xff]  }
   0xe   :  { %979 = vmatmul.mubr.msk.bf16.vlgmr.msra.gmra.mxu0 %vm264_vm1, %v1055_v5  ;;  %1011 = vmatmul.mubr.msk.bf16.vlgmr.msra.gmra.mxu1 %vm264_vm1, %v1071_v10 }
   0xf   :  { %982 = vmatprep.mubr.msk.bf16.mxu0 %vm264_vm1, %v1056_v6  ;;  %1014 = vmatprep.mubr.msk.bf16.mxu1 %vm264_vm1, %v1072_v11 }
  0x16   :  { %983 = vmatmul.mubr.msk.bf16.gmra.mxu0 %vm264_vm1, %v1057_v7  ;;  %1015 = vmatmul.mubr.msk.bf16.gmra.mxu1 %vm264_vm1, %v1073_v14 }
  0x17   :  { %986 = vmatprep.mubr.msk.bf16.mxu0 %vm264_vm1, %v1058_v8  ;;  %1018 = vmatprep.mubr.msk.bf16.mxu1 %vm264_vm1, %v1074_v15 }
  0x1e   :  { %987 = vmatmul.mubr.msk.bf16.gmra.mxu0 %vm264_vm1, %v1059_v12  ;;  %1019 = vmatmul.mubr.msk.bf16.gmra.mxu1 %vm264_vm1, %v1075_v17 }
  0x1f   :  { %990 = vmatprep.mubr.msk.bf16.mxu0 %vm264_vm1, %v1060_v13  ;;  %1022 = vmatprep.mubr.msk.bf16.mxu1 %vm264_vm1, %v1076_v19 }
  0x26   :  { %991 = vmatmul.mubr.msk.bf16.gmra.mxu0 %vm264_vm1, %v1061_v16  ;;  %1023 = vmatmul.mubr.msk.bf16.gmra.mxu1 %vm264_vm1, %v1077_v21 }
  0x27   :  { %994 = vmatprep.mubr.msk.bf16.mxu0 %vm264_vm1, %v1062_v18  ;;  %1026 = vmatprep.mubr.msk.bf16.mxu1 %vm264_vm1, %v1078_v23 }
  0x2e   :  { %995 = vmatmul.mubr.msk.bf16.gmra.mxu0 %vm264_vm1, %v1063_v20  ;;  %1027 = vmatmul.mubr.msk.bf16.gmra.mxu1 %vm264_vm1, %v1079_v25 }
  0x2f   :  { %998 = vmatprep.mubr.msk.bf16.mxu0 %vm264_vm1, %v1064_v22  ;;  %1030 = vmatprep.mubr.msk.bf16.mxu1 %vm264_vm1, %v1080_v27 }
  0x36   :  { %999 = vmatmul.mubr.msk.bf16.gmra.mxu0 %vm264_vm1, %v1065_v24  ;;  %1031 = vmatmul.mubr.msk.bf16.gmra.mxu1 %vm264_vm1, %v1081_v29 }
  0x37   :  { %1002 = vmatprep.mubr.msk.bf16.mxu0 %vm264_vm1, %v1066_v26  ;;  %1034 = vmatprep.mubr.msk.bf16.mxu1 %vm264_vm1, %v1082_v31 }
  0x3e   :  { %1003 = vmatmul.mubr.msk.bf16.gmra.mxu0 %vm264_vm1, %v1067_v28  ;;  %1035 = vmatmul.mubr.msk.bf16.gmra.mxu1 %vm264_vm1, %v1083_v33 }
  0x3f   :  { %1006 = vmatprep.mubr.msk.bf16.mxu0 %vm264_vm1, %v1068_v30  ;;  %1038 = vmatprep.mubr.msk.bf16.mxu1 %vm264_vm1, %v1084_v34 }
  0x46   :  { %1007 = vmatmul.mubr.msk.bf16.gmra.mxu0 %vm264_vm1, %v1069_v32  ;;  %1039 = vmatmul.mubr.msk.bf16.gmra.mxu1 %vm264_vm1, %v1085_v35 }
  0xce   :  { %v980_v36 = vpop.f32.mrf.mxu0  ;;  %v1250_v45 = vpop.f32.mrf.mxu1 }
  0xcf   :  { %v729_v46 = vmul.f32 %v980_v36, %v980_v36 }
  0xd0   :  { %v399_v38 = vpop.f32.mrf.mxu0  ;;  %v1252_v50 = vpop.f32.mrf.mxu1 }
  0xd1   :  { %v727_v41 = vmul.f32 %v399_v38, %v399_v38 }
  0xd2   :  { %v981_v39 = vpop.f32.mrf.mxu0  ;;  %v1254_v55 = vpop.f32.mrf.mxu1 }
  0xd3   :  { %v730_v51 = vmul.f32 %v981_v39, %v981_v39 }
  0xd4   :  { %v402_v40 = vpop.f32.mrf.mxu0  ;;  %v1256_v60 = vpop.f32.mrf.mxu1 }
  0xd5   :  { %v655_v42 = vadd.f32 %v402_v40, %v399_v38  ;;  %v728_v43 = vmul.f32 %v402_v40, %v402_v40 }
  0xd6   :  { %v984_v44 = vpop.f32.mrf.mxu0  ;;  %v1258_v1 = vpop.f32.mrf.mxu1 }
  0xd7   :  { %v656_v47 = vadd.f32 %v980_v36, %v655_v42  ;;  %v791_v48 = vadd.f32 %v728_v43, %v727_v41  ;;  %v733_v2 = vmul.f32 %v984_v44, %v984_v44 }
  0xd8   :  { %v415_v49 = vpop.f32.mrf.mxu0  ;;  %v1260_v10 = vpop.f32.mrf.mxu1 }
  0xd9   :  { %v792_v52 = vadd.f32 %v791_v48, %v729_v46  ;;  %v657_v53 = vadd.f32 %v981_v39, %v656_v47  ;;  %v731_v57 = vmul.f32 %v415_v49, %v415_v49 }
  0xda   :  { %v985_v54 = vpop.f32.mrf.mxu0  ;;  %v1262_v19 = vpop.f32.mrf.mxu1 }
  0xdb   :  { %v658_v56 = vadd.f32 %v657_v53, %v415_v49  ;;  %v793_v58 = vadd.f32 %v792_v52, %v730_v51  ;;  %v734_v6 = vmul.f32 %v985_v54, %v985_v54 }
  0xdc   :  { %v418_v59 = vpop.f32.mrf.mxu0  ;;  %v1264_v28 = vpop.f32.mrf.mxu1 }
  0xdd   :  { %v794_v61 = vadd.f32 %v793_v58, %v731_v57  ;;  %v659_v62 = vadd.f32 %v658_v56, %v418_v59  ;;  %v732_v63 = vmul.f32 %v418_v59, %v418_v59 }
  0xde   :  { %v988_v0 = vpop.f32.mrf.mxu0  ;;  %v1266_v37 = vpop.f32.mrf.mxu1 }
  0xdf   :  { %v660_v3 = vadd.f32 %v984_v44, %v659_v62  ;;  %v795_v4 = vadd.f32 %v794_v61, %v732_v63  ;;  %v737_v20 = vmul.f32 %v988_v0, %v988_v0 }
  0xe0   :  { %v431_v5 = vpop.f32.mrf.mxu0  ;;  %v1268_v47 = vpop.f32.mrf.mxu1 }
  0xe1   :  { %v796_v7 = vadd.f32 %v795_v4, %v733_v2  ;;  %v661_v8 = vadd.f32 %v985_v54, %v660_v3  ;;  %v735_v12 = vmul.f32 %v431_v5, %v431_v5 }
  0xe2   :  { %v989_v9 = vpop.f32.mrf.mxu0  ;;  %v1270_v58 = vpop.f32.mrf.mxu1 }
  0xe3   :  { %v662_v11 = vadd.f32 %v661_v8, %v431_v5  ;;  %v797_v13 = vadd.f32 %v796_v7, %v734_v6  ;;  %v738_v24 = vmul.f32 %v989_v9, %v989_v9 }
  0xe4   :  { %v434_v14 = vpop.f32.mrf.mxu0  ;;  %v1272_v5 = vpop.f32.mrf.mxu1 }
  0xe5   :  { %v798_v15 = vadd.f32 %v797_v13, %v735_v12  ;;  %v663_v16 = vadd.f32 %v662_v11, %v434_v14  ;;  %v736_v17 = vmul.f32 %v434_v14, %v434_v14 }
  0xe6   :  { %v992_v18 = vpop.f32.mrf.mxu0 }
  0xe7   :  { %v664_v21 = vadd.f32 %v988_v0, %v663_v16  ;;  %v799_v22 = vadd.f32 %v798_v15, %v736_v17  ;;  %v741_v38 = vmul.f32 %v992_v18, %v992_v18  ;;  %v1274_v15 = vpop.f32.mrf.mxu1 }
  0xe8   :  { %v447_v23 = vpop.f32.mrf.mxu0 }
  0xe9   :  { %v800_v25 = vadd.f32 %v799_v22, %v737_v20  ;;  %v665_v26 = vadd.f32 %v989_v9, %v664_v21  ;;  %v739_v30 = vmul.f32 %v447_v23, %v447_v23 }
  0xea   :  { %v993_v27 = vpop.f32.mrf.mxu0 }
  0xeb   :  { %v666_v29 = vadd.f32 %v665_v26, %v447_v23  ;;  %v801_v31 = vadd.f32 %v800_v25, %v738_v24  ;;  %v742_v42 = vmul.f32 %v993_v27, %v993_v27  ;;  %v1276_v25 = vpop.f32.mrf.mxu1 }
  0xec   :  { %v450_v32 = vpop.f32.mrf.mxu0 }
  0xed   :  { %v802_v33 = vadd.f32 %v801_v31, %v739_v30  ;;  %v667_v34 = vadd.f32 %v666_v29, %v450_v32  ;;  %v740_v35 = vmul.f32 %v450_v32, %v450_v32 }
  0xee   :  { %v996_v36 = vpop.f32.mrf.mxu0 }
  0xef   :  { %v668_v39 = vadd.f32 %v992_v18, %v667_v34  ;;  %v803_v40 = vadd.f32 %v802_v33, %v740_v35  ;;  %v745_v59 = vmul.f32 %v996_v36, %v996_v36  ;;  %v1278_v35 = vpop.f32.mrf.mxu1 }
  0xf0   :  { %v463_v41 = vpop.f32.mrf.mxu0 }
  0xf1   :  { %v804_v43 = vadd.f32 %v803_v40, %v741_v38  ;;  %v669_v44 = vadd.f32 %v993_v27, %v668_v39  ;;  %v743_v49 = vmul.f32 %v463_v41, %v463_v41 }
  0xf2   :  { %v997_v46 = vpop.f32.mrf.mxu0 }
  0xf3   :  { %v670_v48 = vadd.f32 %v669_v44, %v463_v41  ;;  %v805_v51 = vadd.f32 %v804_v43, %v742_v42  ;;  %v746_v0 = vmul.f32 %v997_v46, %v997_v46 }
  0xf4   :  { %v466_v52 = vpop.f32.mrf.mxu0 }
  0xf5   :  { %v806_v53 = vadd.f32 %v805_v51, %v743_v49  ;;  %v671_v54 = vadd.f32 %v670_v48, %v466_v52  ;;  %v744_v56 = vmul.f32 %v466_v52, %v466_v52 }
  0xf6   :  { %v1000_v57 = vpop.f32.mrf.mxu0 }
  0xf7   :  { %v672_v61 = vadd.f32 %v996_v36, %v671_v54  ;;  %v807_v62 = vadd.f32 %v806_v53, %v744_v56  ;;  %v749_v16 = vmul.f32 %v1000_v57, %v1000_v57 }
  0xf8   :  { %v479_v63 = vpop.f32.mrf.mxu0 }
  0xf9   :  { %v808_v2 = vadd.f32 %v807_v62, %v745_v59  ;;  %v673_v3 = vadd.f32 %v997_v46, %v672_v61  ;;  %v747_v7 = vmul.f32 %v479_v63, %v479_v63  ;;  %v578_v46 = vpop.f32.mrf.mxu1 }
  0xfa   :  { %v1001_v4 = vpop.f32.mrf.mxu0 }
  0xfb   :  { %v674_v6 = vadd.f32 %v673_v3, %v479_v63  ;;  %v809_v8 = vadd.f32 %v808_v2, %v746_v0  ;;  %v750_v21 = vmul.f32 %v1001_v4, %v1001_v4 }
  0xfc   :  { %v482_v9 = vpop.f32.mrf.mxu0 }
  0xfd   :  { %v810_v11 = vadd.f32 %v809_v8, %v747_v7  ;;  %v675_v12 = vadd.f32 %v674_v6, %v482_v9  ;;  %v748_v13 = vmul.f32 %v482_v9, %v482_v9  ;;  %v760_v9 = vmul.f32 %v1256_v60, %v1256_v60 }
  0xfe   :  { %v1004_v14 = vpop.f32.mrf.mxu0 }
  0xff   :  { %v676_v17 = vadd.f32 %v1000_v57, %v675_v12  ;;  %v811_v18 = vadd.f32 %v810_v11, %v748_v13  ;;  %v753_v36 = vmul.f32 %v1004_v14, %v1004_v14  ;;  %v1280_v57 = vpop.f32.mrf.mxu1  ;;  %v761_v13 = vmul.f32 %v1250_v45, %v1250_v45 }
 0x100   :  { %v495_v20 = vpop.f32.mrf.mxu0 }
 0x101   :  { %v812_v22 = vadd.f32 %v811_v18, %v749_v16  ;;  %v677_v23 = vadd.f32 %v1001_v4, %v676_v17  ;;  %v751_v27 = vmul.f32 %v495_v20, %v495_v20  ;;  %v591_v3 = vpop.f32.mrf.mxu1  ;;  %v759_v4 = vmul.f32 %v1252_v50, %v1252_v50 }
 0x102   :  { %v1005_v24 = vpop.f32.mrf.mxu0  ;;  %v762_v17 = vmul.f32 %v1254_v55, %v1254_v55 }
 0x103   :  { %v678_v26 = vadd.f32 %v677_v23, %v495_v20  ;;  %v813_v29 = vadd.f32 %v812_v22, %v750_v21  ;;  %v754_v41 = vmul.f32 %v1005_v24, %v1005_v24  ;;  %v1029_v12 = vpop.f32.mrf.mxu1 }
 0x104   :  { %v498_v30 = vpop.f32.mrf.mxu0 }
 0x105   :  { %v814_v31 = vadd.f32 %v813_v29, %v751_v27  ;;  %v679_v32 = vadd.f32 %v678_v26, %v498_v30  ;;  %v752_v33 = vmul.f32 %v498_v30, %v498_v30  ;;  %v765_v27 = vmul.f32 %v1258_v1, %v1258_v1 }
 0x106   :  { %v1008_v34 = vpop.f32.mrf.mxu0  ;;  %v766_v30 = vmul.f32 %v1262_v19, %v1262_v19 }
 0x107   :  { %v680_v38 = vadd.f32 %v1004_v14, %v679_v32  ;;  %v815_v39 = vadd.f32 %v814_v31, %v752_v33  ;;  %v757_v59 = vmul.f32 %v1008_v34, %v1008_v34 }
 0x108   :  { %v511_v40 = vpop.f32.mrf.mxu0 }
 0x109   :  { %v816_v42 = vadd.f32 %v815_v39, %v753_v36  ;;  %v681_v43 = vadd.f32 %v1005_v24, %v680_v38  ;;  %v755_v49 = vmul.f32 %v511_v40, %v511_v40 }
 0x10a   :  { %v1009_v44 = vpop.f32.mrf.mxu0 }
 0x10b   :  { %v682_v48 = vadd.f32 %v681_v43, %v511_v40  ;;  %v817_v51 = vadd.f32 %v816_v42, %v754_v41  ;;  %v758_v63 = vmul.f32 %v1009_v44, %v1009_v44  ;;  %v769_v40 = vmul.f32 %v1266_v37, %v1266_v37 }
 0x10c   :  { %v514_v52 = vpop.f32.mrf.mxu0  ;;  %v770_v42 = vmul.f32 %v1270_v58, %v1270_v58 }
 0x10d   :  { %v818_v53 = vadd.f32 %v817_v51, %v755_v49  ;;  %v683_v54 = vadd.f32 %v682_v48, %v514_v52  ;;  %v756_v56 = vmul.f32 %v514_v52, %v514_v52  ;;  %v771_v49 = vmul.f32 %v1276_v25, %v1276_v25 }
 0x10f   :  { %v684_v61 = vadd.f32 %v1008_v34, %v683_v54  ;;  %v819_v62 = vadd.f32 %v818_v53, %v756_v56  ;;  %v767_v34 = vmul.f32 %v1268_v47, %v1268_v47  ;;  %v772_v53 = vmul.f32 %v578_v46, %v578_v46 }
 0x111   :  { %v685_v0 = vadd.f32 %v1009_v44, %v684_v61  ;;  %v820_v2 = vadd.f32 %v819_v62, %v757_v59 }
 0x113   :  { %v821_v6 = vadd.f32 %v820_v2, %v758_v63  ;;  %v686_v7 = vadd.f32 %v685_v0, %v1252_v50  ;;  %v594_v50 = vpop.f32.mrf.mxu1 }
 0x115   :  { %v687_v8 = vadd.f32 %v686_v7, %v1256_v60  ;;  %v822_v11 = vadd.f32 %v821_v6, %v759_v4  ;;  %v763_v60 = vmul.f32 %v1260_v10, %v1260_v10  ;;  %v1032_v26 = vpop.f32.mrf.mxu1 }
 0x117   :  { %v688_v14 = vadd.f32 %v1250_v45, %v687_v8  ;;  %v823_v16 = vadd.f32 %v822_v11, %v760_v9  ;;  %v764_v45 = vmul.f32 %v1264_v28, %v1264_v28  ;;  %v607_v32 = vpop.f32.mrf.mxu1  ;;  %v777_v8 = vmul.f32 %v1280_v57, %v1280_v57 }
 0x118   :  { %v778_v11 = vmul.f32 %v1029_v12, %v1029_v12 }
 0x119   :  { %v824_v18 = vadd.f32 %v823_v16, %v761_v13  ;;  %v689_v20 = vadd.f32 %v1254_v55, %v688_v14  ;;  %v1033_v39 = vpop.f32.mrf.mxu1 }
 0x11b   :  { %v690_v21 = vadd.f32 %v689_v20, %v1260_v10  ;;  %v825_v22 = vadd.f32 %v824_v18, %v762_v17  ;;  %v610_v44 = vpop.f32.mrf.mxu1 }
 0x11d   :  { %v826_v23 = vadd.f32 %v825_v22, %v763_v60  ;;  %v691_v24 = vadd.f32 %v690_v21, %v1264_v28  ;;  %v1036_v54 = vpop.f32.mrf.mxu1  ;;  %v780_v21 = vmul.f32 %v610_v44, %v610_v44  ;;  %v781_v22 = vmul.f32 %v1032_v26, %v1032_v26 }
 0x11f   :  { %v692_v29 = vadd.f32 %v1258_v1, %v691_v24  ;;  %v827_v55 = vadd.f32 %v826_v23, %v764_v45  ;;  %v768_v1 = vmul.f32 %v1272_v5, %v1272_v5  ;;  %v623_v63 = vpop.f32.mrf.mxu1  ;;  %v782_v24 = vmul.f32 %v1033_v39, %v1033_v39 }
 0x121   :  { %v828_v31 = vadd.f32 %v827_v55, %v765_v27  ;;  %v693_v10 = vadd.f32 %v1262_v19, %v692_v29  ;;  %v1037_v7 = vpop.f32.mrf.mxu1  ;;  %v783_v55 = vmul.f32 %v623_v63, %v623_v63 }
 0x123   :  { %v694_v33 = vadd.f32 %v693_v10, %v1268_v47  ;;  %v829_v28 = vadd.f32 %v828_v31, %v766_v30  ;;  %v626_v16 = vpop.f32.mrf.mxu1 }
 0x124   :  { %v784_v10 = vmul.f32 %v626_v16, %v626_v16 }
 0x125   :  { %v830_v36 = vadd.f32 %v829_v28, %v767_v34  ;;  %v695_v38 = vadd.f32 %v694_v33, %v1272_v5  ;;  %v1040_v60 = vpop.f32.mrf.mxu1 }
 0x127   :  { %v696_v41 = vadd.f32 %v1266_v37, %v695_v38  ;;  %v831_v19 = vadd.f32 %v830_v36, %v768_v1  ;;  %v773_v37 = vmul.f32 %v1274_v15, %v1274_v15  ;;  %v639_v29 = vpop.f32.mrf.mxu1  ;;  %v786_v36 = vmul.f32 %v1037_v7, %v1037_v7 }
 0x129   :  { %v832_v43 = vadd.f32 %v831_v19, %v769_v40  ;;  %v697_v47 = vadd.f32 %v1270_v58, %v696_v41  ;;  %v774_v58 = vmul.f32 %v1278_v35, %v1278_v35  ;;  %v1041_v33 = vpop.f32.mrf.mxu1  ;;  %v787_v41 = vmul.f32 %v639_v29, %v639_v29 }
 0x12b   :  { %v698_v48 = vadd.f32 %v697_v47, %v1276_v25  ;;  %v833_v5 = vadd.f32 %v832_v43, %v770_v42  ;;  %v775_v25 = vmul.f32 %v591_v3, %v591_v3  ;;  %v642_v40 = vpop.f32.mrf.mxu1  ;;  %v789_v47 = vmul.f32 %v1040_v60, %v1040_v60 }
 0x12c   :  { %v788_v43 = vmul.f32 %v642_v40, %v642_v40 }
 0x12d   :  { %v834_v51 = vadd.f32 %v833_v5, %v771_v49  ;;  %v699_v52 = vadd.f32 %v698_v48, %v578_v46  ;;  %v776_v46 = vmul.f32 %v594_v50, %v594_v50  ;;  %v790_v49 = vmul.f32 %v1041_v33, %v1041_v33 }
 0x12f   :  { %v700_v56 = vadd.f32 %v1274_v15, %v699_v52  ;;  %v835_v59 = vadd.f32 %v834_v51, %v772_v53 }
 0x131   :  { %v836_v61 = vadd.f32 %v835_v59, %v773_v37  ;;  %v701_v62 = vadd.f32 %v1278_v35, %v700_v56  ;;  %v779_v35 = vmul.f32 %v607_v32, %v607_v32 }
 0x133   :  { %v702_v0 = vadd.f32 %v701_v62, %v591_v3  ;;  %v837_v2 = vadd.f32 %v836_v61, %v774_v58 }
 0x135   :  { %v838_v4 = vadd.f32 %v837_v2, %v775_v25  ;;  %v703_v6 = vadd.f32 %v702_v0, %v594_v50  ;;  %v654_v0 = vld [vmem:[%s1344_s2] sm:$0x1] }
 0x137   :  { %v704_v15 = vadd.f32 %v1280_v57, %v703_v6  ;;  %v839_v9 = vadd.f32 %v838_v4, %v776_v46  ;;  %v726_v4 = vld [vmem:[%s1345_s3] sm:$0x1] }
 0x139   :  { %v840_v13 = vadd.f32 %v839_v9, %v777_v8  ;;  %v705_v14 = vadd.f32 %v1029_v12, %v704_v15 }
 0x13b   :  { %v706_v17 = vadd.f32 %v705_v14, %v607_v32  ;;  %v841_v18 = vadd.f32 %v840_v13, %v778_v11  ;;  %v785_v32 = vmul.f32 %v1036_v54, %v1036_v54 }
 0x13d   :  { %v842_v20 = vadd.f32 %v841_v18, %v779_v35  ;;  %v707_v3 = vadd.f32 %v706_v17, %v610_v44 }
 0x13f   :  { %v708_v50 = vadd.f32 %v1032_v26, %v707_v3  ;;  %v843_v23 = vadd.f32 %v842_v20, %v780_v21 }
 0x141   :  { %v844_v45 = vadd.f32 %v843_v23, %v781_v22  ;;  %v709_v27 = vadd.f32 %v1033_v39, %v708_v50 }
 0x143   :  { %v710_v57 = vadd.f32 %v709_v27, %v623_v63  ;;  %v845_v30 = vadd.f32 %v844_v45, %v782_v24 }
 0x145   :  { %v846_v31 = vadd.f32 %v845_v30, %v783_v55  ;;  %v711_v12 = vadd.f32 %v710_v57, %v626_v16 }
 0x147   :  { %v712_v34 = vadd.f32 %v1036_v54, %v711_v12  ;;  %v847_v28 = vadd.f32 %v846_v31, %v784_v10 }
 0x149   :  { %v848_v38 = vadd.f32 %v847_v28, %v785_v32  ;;  %v713_v1 = vadd.f32 %v1037_v7, %v712_v34 }
 0x14b   :  { %v714_v26 = vadd.f32 %v713_v1, %v639_v29  ;;  %v849_v19 = vadd.f32 %v848_v38, %v786_v36 }
 0x14d   :  { %v850_v42 = vadd.f32 %v849_v19, %v787_v41  ;;  %v715_v39 = vadd.f32 %v714_v26, %v642_v40 }
 0x14f   :  { %v716_v44 = vadd.f32 %v1040_v60, %v715_v39  ;;  %v851_v48 = vadd.f32 %v850_v42, %v788_v43 }
 0x151   :  { %v717_v5 = vadd.f32 %v1041_v33, %v716_v44  ;;  %v852_v51 = vadd.f32 %v851_v48, %v789_v47 }
 0x153   :  { %v718_v52 = vrot.slane %v717_v5, 4  ;;  %v853_v53 = vadd.f32 %v852_v51, %v790_v49 }
 0x155   :  { %v719_v54 = vadd.f32 %v718_v52, %v717_v5  ;;  %v854_v37 = vrot.slane %v853_v53, 4 }
 0x157   :  { %v720_v56 = vrot.slane %v719_v54, 2  ;;  %v855_v59 = vadd.f32 %v854_v37, %v853_v53 }
 0x159   :  { %v721_v58 = vadd.f32 %v720_v56, %v719_v54  ;;  %v856_v61 = vrot.slane %v855_v59, 2 }
 0x15b   :  { %v722_v62 = vrot.slane %v721_v58, 1  ;;  %v857_v63 = vadd.f32 %v856_v61, %v855_v59 }
 0x15d   :  { %v723_v25 = vadd.f32 %v722_v62, %v721_v58  ;;  %v858_v2 = vrot.slane %v857_v63, 1 }
 0x15f   :  { %v724_v6 = vadd.f32 %v723_v25, %v654_v0  ;;  %v859_v46 = vadd.f32 %v858_v2, %v857_v63 }
 0x161   :  { %725 = vst [vmem:[%s1344_s2] sm:$0x1] %v724_v6  ;;  %v860_v7 = vadd.f32 %v859_v46, %v726_v4 }
 0x163   :  { %861 = vst [vmem:[%s1345_s3] sm:$0x1] %v860_v7 }

</bundles_post_ra>
